<compile_context>
chip_gen: v7x
topology: tpu7x:2x2x1
jax: 0.10.0
libtpu: 0.0.40
codegen_flags: <defaults>
</compile_context>

<pallas_src>
import math
import functools

import jax
import jax.numpy as jnp
from jax import lax
from jax.experimental import pallas as pl
from jax.experimental.pallas import tpu as pltpu

_PAR = "parallel"
_ARB = "arbitrary"

# MXU operand dtype (f32 accumulation everywhere). jnp.float32 => bit-level parity.
MXU_DTYPE = jnp.bfloat16


# ------------------------------ small helpers -------------------------------

def _round_up(x, m):
    return ((x + m - 1) // m) * m


def _pick_div(n, candidates):
    for c in candidates:
        if n % c == 0:
            return c
    return n


def _seq_tile(s, cap=256):
    for t in (256, 128, 64, 32, 16, 8):
        if t <= cap and s % t == 0:
            return t
    return s


def _fit(dim, target):
    """(block_size, padded_dim) for one dimension: full dim if it fits, else tile."""
    if dim <= target:
        return dim, dim
    return target, _round_up(dim, target)


def _pad2(x, rows, cols):
    r, c = x.shape
    if (r, c) == (rows, cols):
        return x
    return jnp.pad(x, ((0, rows - r), (0, cols - c)))


@functools.lru_cache(maxsize=None)
def _vmem_capacity():
    try:
        return int(pltpu.get_tpu_info().vmem_capacity_bytes)
    except Exception:          # be conservative (v7x-sized) if the probe is unavailable
        return 64 << 20


def _mosaic_params(semantics, est_bytes=None):
    """dimension_semantics always; explicit vmem budget only when blocks exceed the
    32 MiB scoped default (makes v7x failures deterministic, claims headroom on
    v5e/v6e deliberately)."""
    vmem = None
    if est_bytes is not None and est_bytes > (30 << 20):
        vmem = min(int(est_bytes), 112 << 20)
    return pltpu.CompilerParams(dimension_semantics=semantics, vmem_limit_bytes=vmem)


# --------------------------- tiled linear (matmul) ---------------------------

def _linear_kernel(x_ref, w_ref, b_ref, o_ref, acc_ref):
    @pl.when(pl.program_id(2) == 0)
    def _():
        acc_ref[...] = jnp.zeros_like(acc_ref)

    acc_ref[...] += jnp.dot(x_ref[...].astype(w_ref.dtype), w_ref[...],
                            preferred_element_type=jnp.float32)

    @pl.when(pl.program_id(2) == pl.num_programs(2) - 1)
    def _():
        o_ref[...] = (acc_ref[...] + b_ref[...]).astype(o_ref.dtype)


def linear(x, w, b, *, tiles=None):
    """Tiled, pipelined y = x @ w + b.  x: [N, K] f32, w: [K, Dout] (bf16), b: [Dout]."""
    N, K = x.shape
    Dout = w.shape[1]
    if tiles is None:
        big = _vmem_capacity() >= (100 << 20)      # v5e / v6e: 128 MiB physical VMEM
        tiles = (512, 512, 512) if big else (256, 256, 512)
    tm, Np = _fit(N, tiles[0])
    tn, Dp = _fit(Dout, tiles[1])
    tk, Kp = _fit(K, tiles[2])
    xp = _pad2(x, Np, Kp)          # no-ops when shapes are already tile-aligned
    wp = _pad2(w, Kp, Dp)
    bp = _pad2(b.reshape(1, Dout), 1, Dp)
    out = pl.pallas_call(
        _linear_kernel,
        out_shape=jax.ShapeDtypeStruct((Np, Dp), x.dtype),
        grid=(Np // tm, Dp // tn, Kp // tk),              # reduction axis (K) last
        in_specs=[
            pl.BlockSpec((tm, tk), lambda i, j, k: (i, k)),
            pl.BlockSpec((tk, tn), lambda i, j, k: (k, j)),
            pl.BlockSpec((1, tn), lambda i, j, k: (0, j)),
        ],
        out_specs=pl.BlockSpec((tm, tn), lambda i, j, k: (i, j)),
        scratch_shapes=[pltpu.VMEM((tm, tn), jnp.float32)],
        compiler_params=_mosaic_params((_PAR, _PAR, _ARB)),
    )(xp, wp, bp)
    if (Np, Dp) != (N, Dout):
        out = out[:N, :Dout]
    return out


# ----------------- fused: out-proj + bias + residual + LayerNorm -------------

def _proj_ln_kernel(a_ref, w_ref, b_ref, res_ref, g_ref, be_ref, o_ref):
    # LayerNorm(res + (a @ w + b)) * gamma + beta, eps=1e-5 (PyTorch post-norm).
    y = jnp.dot(a_ref[...].astype(w_ref.dtype), w_ref[...],
                preferred_element_type=jnp.float32) + b_ref[...]
    z = y + res_ref[...]
    mean = jnp.mean(z, axis=-1, keepdims=True)
    var = jnp.mean(jnp.square(z - mean), axis=-1, keepdims=True)
    zn = (z - mean) * lax.rsqrt(var + 1e-5)
    o_ref[...] = (zn * g_ref[...] + be_ref[...]).astype(o_ref.dtype)


def proj_add_layernorm(a, w, b, res, gamma, beta, *, tm_target=256):
    """Fused LN(res + a @ w + b).  a: [N, K], w: [K, D], res: [N, D]."""
    N, K = a.shape
    D = w.shape[1]
    tm, Np = _fit(N, tm_target)
    ap = _pad2(a, Np, K)
    rp = _pad2(res, Np, D)
    wsz = jnp.dtype(w.dtype).itemsize
    est = 2 * (tm * K * 4 + K * D * wsz + 2 * tm * D * 4 + 3 * D * 4)
    out = pl.pallas_call(
        _proj_ln_kernel,
        out_shape=jax.ShapeDtypeStruct((Np, D), a.dtype),
        grid=(Np // tm,),
        in_specs=[
            pl.BlockSpec((tm, K), lambda i: (i, 0)),
            pl.BlockSpec((K, D), lambda i: (0, 0)),       # weight resident in VMEM
            pl.BlockSpec((1, D), lambda i: (0, 0)),
            pl.BlockSpec((tm, D), lambda i: (i, 0)),
            pl.BlockSpec((1, D), lambda i: (0, 0)),
            pl.BlockSpec((1, D), lambda i: (0, 0)),
        ],
        out_specs=pl.BlockSpec((tm, D), lambda i: (i, 0)),
        compiler_params=_mosaic_params((_PAR,), est),
    )(ap, w, b.reshape(1, D), rp, gamma.reshape(1, D), beta.reshape(1, D))
    return out[:N] if Np != N else out


# -------------- fused FFN (d_hid-tiled): relu(x@w1+b1)@w2+b2 + res + LN ------

def _ffn_ln_kernel(x_ref, w1_ref, b1_ref, w2_ref, b2_ref, g_ref, be_ref,
                   o_ref, acc_ref):
    hstep = pl.program_id(1)

    @pl.when(hstep == 0)
    def _():
        acc_ref[...] = jnp.zeros_like(acc_ref)

    # One d_hid chunk: the hidden activation never touches HBM, and only
    # (D, th) / (th, D) weight chunks are resident at a time.
    x = x_ref[...]
    h = jnp.dot(x.astype(w1_ref.dtype), w1_ref[...],
                preferred_element_type=jnp.float32) + b1_ref[...]
    h = jnp.maximum(h, 0.0)
    acc_ref[...] += jnp.dot(h.astype(w2_ref.dtype), w2_ref[...],
                            preferred_element_type=jnp.float32)

    @pl.when(hstep == pl.num_programs(1) - 1)
    def _():
        z = x + acc_ref[...] + b2_ref[...]
        mean = jnp.mean(z, axis=-1, keepdims=True)
        var = jnp.mean(jnp.square(z - mean), axis=-1, keepdims=True)
        zn = (z - mean) * lax.rsqrt(var + 1e-5)
        o_ref[...] = (zn * g_ref[...] + be_ref[...]).astype(o_ref.dtype)


def ffn_add_layernorm(x, w1, b1, w2, b2, gamma, beta, *, tm_target=256,
                      th_target=512):
    N, D = x.shape
    H = w1.shape[1]                       # padded to a multiple of 128 at init
    tm, Np = _fit(N, tm_target)
    th = _pick_div(H, (th_target, 256, 128))
    xp = _pad2(x, Np, D)
    wsz = jnp.dtype(w1.dtype).itemsize
    est = 2 * (2 * tm * D * 4 + 2 * D * th * wsz + th * 4 + 3 * D * 4) + tm * D * 4
    out = pl.pallas_call(
        _ffn_ln_kernel,
        out_shape=jax.ShapeDtypeStruct((Np, D), x.dtype),
        grid=(Np // tm, H // th),                         # d_hid reduction axis last
        in_specs=[
            pl.BlockSpec((tm, D), lambda i, h: (i, 0)),
            pl.BlockSpec((D, th), lambda i, h: (0, h)),
            pl.BlockSpec((1, th), lambda i, h: (0, h)),
            pl.BlockSpec((th, D), lambda i, h: (h, 0)),
            pl.BlockSpec((1, D), lambda i, h: (0, 0)),
            pl.BlockSpec((1, D), lambda i, h: (0, 0)),
            pl.BlockSpec((1, D), lambda i, h: (0, 0)),
        ],
        out_specs=pl.BlockSpec((tm, D), lambda i, h: (i, 0)),
        scratch_shapes=[pltpu.VMEM((tm, D), jnp.float32)],
        compiler_params=_mosaic_params((_PAR, _ARB), est),
    )(xp, w1, b1.reshape(1, H), w2, b2.reshape(1, D),
      gamma.reshape(1, D), beta.reshape(1, D))
    return out[:N] if Np != N else out


# ------------------------------- attention -----------------------------------

def _softmax_rows(s):
    m = jnp.max(s, axis=-1, keepdims=True)
    p = jnp.exp(s - m)
    inv = pl.reciprocal(jnp.sum(p, axis=-1, keepdims=True), approx=False)  # exact
    return p * inv


def _attn_head_kernel(q_ref, k_ref, v_ref, o_ref, *, scale, mxu_dtype):
    S = q_ref.shape[1]
    q = (q_ref[0] * scale).astype(mxu_dtype)       # fold 1/sqrt(hd) into q (S*hd muls)
    k = k_ref[0].astype(mxu_dtype)
    s = lax.dot_general(q, k, (((1,), (1,)), ((), ())),
                        preferred_element_type=jnp.float32)
    row = lax.broadcasted_iota(jnp.int32, (S, S), 0)
    col = lax.broadcasted_iota(jnp.int32, (S, S), 1)
    s = jnp.where(col <= row, s, -jnp.inf)          # causal mask built in-kernel
    p = _softmax_rows(s)
    o_ref[0] = jnp.dot(p.astype(mxu_dtype), v_ref[0].astype(mxu_dtype),
                       preferred_element_type=jnp.float32).astype(o_ref.dtype)


def _attn_batch_kernel(qkv_ref, o_ref, *, nhead, d_model, scale, mxu_dtype):
    D = d_model
    hd = D // nhead
    qkv = qkv_ref[0]                                # (S, 3D) for this batch element
    S = qkv.shape[0]
    row = lax.broadcasted_iota(jnp.int32, (S, S), 0)
    col = lax.broadcasted_iota(jnp.int32, (S, S), 1)
    causal = col <= row
    for h in range(nhead):                          # nhead: small static int
        q = (qkv[:, h * hd:(h + 1) * hd] * scale).astype(mxu_dtype)
        k = qkv[:, D + h * hd:D + (h + 1) * hd].astype(mxu_dtype)
        v = qkv[:, 2 * D + h * hd:2 * D + (h + 1) * hd].astype(mxu_dtype)
        s = lax.dot_general(q, k, (((1,), (1,)), ((), ())),
                            preferred_element_type=jnp.float32)
        s = jnp.where(causal, s, -jnp.inf)
        p = _softmax_rows(s)
        # Write each head straight into its output columns: no concat, the head's
        # vregs retire immediately (static column slices of a ref are cheap).
        o_ref[0, :, h * hd:(h + 1) * hd] = jnp.dot(
            p.astype(mxu_dtype), v,
            preferred_element_type=jnp.float32).astype(o_ref.dtype)


def attention(qkv, nhead, scale):
    """qkv: [B, S, 3*D] fused projections (batch-major, head columns contiguous).
    Returns [B, S, D]. The standard causal mask is generated inside the kernel."""
    B, S, threeD = qkv.shape
    D = threeD // 3
    hd = D // nhead
    # TODO(synk): for long sequences switch to a flash-style tiled online-softmax
    # kernel; the full [S, S] score block scales quadratically in VMEM.
    if hd % 128 == 0:
        # Head-split grid: per-step VMEM ~ 3*S*hd instead of S*3D, and (B, nhead)
        # gives the megacore two parallel axes to shard.
        return pl.pallas_call(
            functools.partial(_attn_head_kernel, scale=scale, mxu_dtype=MXU_DTYPE),
            out_shape=jax.ShapeDtypeStruct((B, S, D), qkv.dtype),
            grid=(B, nhead),
            in_specs=[
                pl.BlockSpec((1, S, hd), lambda b, h: (b, 0, h)),
                pl.BlockSpec((1, S, hd), lambda b, h, nh=nhead: (b, 0, nh + h)),
                pl.BlockSpec((1, S, hd), lambda b, h, nh=nhead: (b, 0, 2 * nh + h)),
            ],
            out_specs=pl.BlockSpec((1, S, hd), lambda b, h: (b, 0, h)),
            compiler_params=_mosaic_params((_PAR, _PAR)),
        )(qkv, qkv, qkv)
    # Fallback for lane-unaligned head dims (e.g. the small test config): one batch
    # element per grid step, static per-head loop inside the kernel.
    return pl.pallas_call(
        functools.partial(_attn_batch_kernel, nhead=nhead, d_model=D, scale=scale,
                          mxu_dtype=MXU_DTYPE),
        out_shape=jax.ShapeDtypeStruct((B, S, D), qkv.dtype),
        grid=(B,),
        in_specs=[pl.BlockSpec((1, S, threeD), lambda b: (b, 0, 0))],
        out_specs=pl.BlockSpec((1, S, D), lambda b: (b, 0, 0)),
        compiler_params=_mosaic_params((_PAR,)),
    )(qkv)


# -------- decoder: logits written directly in seq-major (S, B, V) layout -----

def _decoder_kernel(x_ref, w_ref, b_ref, o_ref):
    o_ref[...] = (jnp.dot(x_ref[0].astype(w_ref.dtype), w_ref[...],
                          preferred_element_type=jnp.float32)
                  + b_ref[...]).astype(o_ref.dtype)


def decoder_logits(xf, w, b, B, S):
    """Decoder projection; the (B,S)->(S,B) permutation is folded into the
    out_spec index_map so the largest tensor is never transposed by XLA.
    xf: [B*S, D] batch-major tokens; w: [D, Vp]; b: [Vp]. Returns [S, B, Vp]."""
    D = xf.shape[1]
    Vp = w.shape[1]
    x3 = xf.reshape(B, S, D)                       # free: contiguous reshape
    ts = _seq_tile(S)
    big = _vmem_capacity() >= (100 << 20)
    tn = _pick_div(Vp, ((512 if big else 256), 256, 128))
    nvt = Vp // tn
    out = pl.pallas_call(
        _decoder_kernel,
        out_shape=jax.ShapeDtypeStruct((S, B * Vp), jnp.float32),
        grid=(S // ts, B, nvt),
        in_specs=[
            pl.BlockSpec((1, ts, D), lambda s, b, n: (b, s, 0)),
            pl.BlockSpec((D, tn), lambda s, b, n: (0, n)),
            pl.BlockSpec((1, tn), lambda s, b, n: (0, n)),
        ],
        out_specs=pl.BlockSpec((ts, tn), lambda s, b, n, _nvt=nvt: (s, b * _nvt + n)),
        compiler_params=_mosaic_params((_PAR, _PAR, _PAR)),
    )(x3, w, b.reshape(1, Vp))
    return out.reshape(S, B, Vp)


# ---------------------------- model glue (plain JAX) -------------------------

def make_pe(d_model, max_len=5000):
    position = jnp.arange(max_len, dtype=jnp.float32)[:, None]
    div_term = jnp.exp(jnp.arange(0, d_model, 2, dtype=jnp.float32)
                       * (-math.log(10000.0) / d_model))
    pe = jnp.zeros((max_len, 1, d_model), jnp.float32)
    pe = pe.at[:, 0, 0::2].set(jnp.sin(position * div_term))
    pe = pe.at[:, 0, 1::2].set(jnp.cos(position * div_term))
    return pe


def init_params(key, ntoken, d_model, nhead, d_hid, nlayers):
    keys = jax.random.split(key, 2 + nlayers)

    def u(k, shape, scale=0.1):
        return jax.random.uniform(k, shape, jnp.float32, -scale, scale)

    # Pad vocab / FFN-hidden dims to lane multiples ONCE here (zero rows/cols are
    # mathematically exact) so per-layer pallas calls see lane-dense shapes and no
    # per-layer jnp.pad / slice round trips are emitted.
    hp = _round_up(d_hid, 128)
    vp = _round_up(ntoken, 128)

    params = {
        "emb": u(keys[0], (ntoken, d_model)),              # nn.Embedding(ntoken, d_model)
        "pe": make_pe(d_model),
        "w_dec": jnp.pad(u(keys[1], (d_model, ntoken)),    # nn.Linear(d_model, ntoken)
                         ((0, 0), (0, vp - ntoken))).astype(MXU_DTYPE),
        "b_dec": jnp.zeros((vp,), jnp.float32),
        "layers": [],
    }
    for li in range(nlayers):
        lk = jax.random.split(keys[2 + li], 4)
        params["layers"].append({
            # MultiheadAttention in/out projections (stored as [in, out], bf16)
            "w_in": u(lk[0], (d_model, 3 * d_model)).astype(MXU_DTYPE),
            "b_in": jnp.zeros((3 * d_model,), jnp.float32),
            "w_out": u(lk[1], (d_model, d_model)).astype(MXU_DTYPE),
            "b_out": jnp.zeros((d_model,), jnp.float32),
            # feed-forward (d_hid padded to hp; zero pad columns/rows are exact)
            "w1": jnp.pad(u(lk[2], (d_model, d_hid)),
                          ((0, 0), (0, hp - d_hid))).astype(MXU_DTYPE),
            "b1": jnp.zeros((hp,), jnp.float32),
            "w2": jnp.pad(u(lk[3], (d_hid, d_model)),
                          ((0, hp - d_hid), (0, 0))).astype(MXU_DTYPE),
            "b2": jnp.zeros((d_model,), jnp.float32),
            # layer norms (f32)
            "g1": jnp.ones((d_model,), jnp.float32),
            "be1": jnp.zeros((d_model,), jnp.float32),
            "g2": jnp.ones((d_model,), jnp.float32),
            "be2": jnp.zeros((d_model,), jnp.float32),
        })
    return params


def encoder_layer(xf, lp, nhead, B, S):
    """Post-norm TransformerEncoderLayer (PyTorch defaults: relu, norm_first=False).
    xf: [B*S, D] batch-major flattened tokens."""
    D = xf.shape[1]
    hd = D // nhead
    qkv = linear(xf, lp["w_in"], lp["b_in"])                       # (B*S, 3D)
    ao = attention(qkv.reshape(B, S, 3 * D), nhead, 1.0 / math.sqrt(hd))
    x1 = proj_add_layernorm(ao.reshape(B * S, D), lp["w_out"], lp["b_out"],
                            xf, lp["g1"], lp["be1"])
    return ffn_add_layernorm(x1, lp["w1"], lp["b1"], lp["w2"], lp["b2"],
                             lp["g2"], lp["be2"])


def transformer_model(src, src_mask, params, *, nhead, ntoken):
    """src: [seq_len, batch] int tokens; src_mask: [seq_len, seq_len] additive mask.
    Returns [seq_len, batch, ntoken] logits (same layout as the PyTorch reference)."""
    del src_mask
    # TODO(synk): the attention kernel builds the standard causal mask in-kernel
    # (what the reference training loop always passes); arbitrary additive masks are
    # not plumbed through.
    S, B = src.shape
    D = params["emb"].shape[1]
    # Embedding gather + positional encoding kept in XLA; done directly in batch-major
    # layout so no activation-sized transpose is ever materialized.
    x = jnp.take(params["emb"], src.T, axis=0) * math.sqrt(D)      # (B, S, D)
    x = x + params["pe"][:S, 0, :][None]
    # TODO(synk): dropout (p=0.2 / 0.5) treated as identity (eval-mode semantics).
    xf = x.reshape(B * S, D)
    for lp in params["layers"]:
        xf = encoder_layer(xf, lp, nhead, B, S)
    logits = decoder_logits(xf, params["w_dec"], params["b_dec"], B, S)  # (S, B, Vp)
    return logits[:, :, :ntoken]       # single slice on the final output only


# ----------------------------------- main ------------------------------------

if __name__ == "__main__":
    # Small shapes consistent with the module: seq=8, batch=2, d_model=32,
    # nhead=2, d_hid=200, nlayers=2, ntoken=50.
    ntoken, d_model, nhead, d_hid, nlayers = 50, 32, 2, 200, 2
    S, B = 8, 2

    key = jax.random.PRNGKey(0)
    kp, ks = jax.random.split(key)
    params = init_params(kp, ntoken, d_model, nhead, d_hid, nlayers)

    src = jax.random.randint(ks, (S, B), 0, ntoken, dtype=jnp.int32)
    # Causal additive mask as produced by generate_square_subsequent_mask.
    src_mask = jnp.triu(jnp.full((S, S), -jnp.inf, dtype=jnp.float32), k=1)

    fwd = jax.jit(functools.partial(transformer_model, nhead=nhead, ntoken=ntoken))
    out = jax.block_until_ready(fwd(src, src_mask, params))
    assert out.shape == (S, B, ntoken), out.shape
    assert bool(jnp.all(jnp.isfinite(out)))
    print("KERNEL_OK")
</pallas_src>

<mosaic_0001>
module attributes {stable_mosaic.version = 11 : i64} {
  func.func @_linear_kernel(%arg0: i32, %arg1: i32, %arg2: i32, %arg3: memref<16x32xf32, #tpu.memory_space<vmem>>, %arg4: memref<32x96xbf16, #tpu.memory_space<vmem>>, %arg5: memref<1x96xf32, #tpu.memory_space<vmem>>, %arg6: memref<16x96xf32, #tpu.memory_space<vmem>>, %arg7: memref<16x96xf32, #tpu.memory_space<vmem>>) attributes {dimension_semantics = [#tpu.dimension_semantics<parallel>, #tpu.dimension_semantics<parallel>, #tpu.dimension_semantics<arbitrary>], iteration_bounds = array<i64: 1, 1, 1>, scalar_prefetch = 0 : i64, scratch_operands = 1 : i64, tpu.core_type = #tpu.core_type<tc>, window_params = [{transform_indices = @transform_0, window_bounds = array<i64: 16, 32>}, {transform_indices = @transform_1, window_bounds = array<i64: 32, 96>}, {transform_indices = @transform_2, window_bounds = array<i64: 1, 96>}, {transform_indices = @transform_3, window_bounds = array<i64: 16, 96>}]} {
    %c0_i32 = arith.constant 0 : i32
    %0 = arith.cmpi eq, %arg2, %c0_i32 : i32
    %1 = arith.extui %0 : i1 to i32
    %c0_i32_0 = arith.constant 0 : i32
    %2 = arith.cmpi ne, %1, %c0_i32_0 : i32
    scf.if %2 {
      %cst_10 = arith.constant 0.000000e+00 : f32
      %13 = vector.broadcast %cst_10 : f32 to vector<16x96xf32>
      %c0_11 = arith.constant 0 : index
      %c0_12 = arith.constant 0 : index
      %14 = vector.load %arg7[%c0_11, %c0_12] : memref<16x96xf32, #tpu.memory_space<vmem>>, vector<16x96xf32>
      tpu.vector_store %arg7[%c0_11, %c0_12], %13 {strides = array<i32>} : memref<16x96xf32, #tpu.memory_space<vmem>>, vector<16x96xf32>,
    } else {
    }
    %c0 = arith.constant 0 : index
    %c0_1 = arith.constant 0 : index
    %3 = vector.load %arg7[%c0, %c0_1] : memref<16x96xf32, #tpu.memory_space<vmem>>, vector<16x96xf32>
    %c0_2 = arith.constant 0 : index
    %c0_3 = arith.constant 0 : index
    %4 = vector.load %arg3[%c0_2, %c0_3] : memref<16x32xf32, #tpu.memory_space<vmem>>, vector<16x32xf32>
    %5 = arith.truncf %4 : vector<16x32xf32> to vector<16x32xbf16>
    %c0_4 = arith.constant 0 : index
    %c0_5 = arith.constant 0 : index
    %6 = vector.load %arg4[%c0_4, %c0_5] : memref<32x96xbf16, #tpu.memory_space<vmem>>, vector<32x96xbf16>
    %cst = arith.constant dense<0.000000e+00> : vector<16x96xf32>
    %7 = tpu.matmul %5, %6, %cst {dimension_numbers = #tpu.dot_dimension_numbers<[1], [0], [0], [1], [0, 0, 1, 1], [], []>} : vector<16x32xbf16>, vector<32x96xbf16>, vector<16x96xf32> -> vector<16x96xf32>
    %8 = arith.addf %3, %7 : vector<16x96xf32>
    %c0_6 = arith.constant 0 : index
    %c0_7 = arith.constant 0 : index
    %9 = vector.load %arg7[%c0_6, %c0_7] : memref<16x96xf32, #tpu.memory_space<vmem>>, vector<16x96xf32>
    tpu.vector_store %arg7[%c0_6, %c0_7], %8 {strides = array<i32>} : memref<16x96xf32, #tpu.memory_space<vmem>>, vector<16x96xf32>,
    %c0_i32_8 = arith.constant 0 : i32
    %10 = arith.cmpi eq, %arg2, %c0_i32_8 : i32
    %11 = arith.extui %10 : i1 to i32
    %c0_i32_9 = arith.constant 0 : i32
    %12 = arith.cmpi ne, %11, %c0_i32_9 : i32
    scf.if %12 {
      %c0_10 = arith.constant 0 : index
      %c0_11 = arith.constant 0 : index
      %13 = vector.load %arg7[%c0_10, %c0_11] : memref<16x96xf32, #tpu.memory_space<vmem>>, vector<16x96xf32>
      %c0_12 = arith.constant 0 : index
      %c0_13 = arith.constant 0 : index
      %14 = vector.load %arg5[%c0_12, %c0_13] : memref<1x96xf32, #tpu.memory_space<vmem>>, vector<1x96xf32>
      %15 = vector.broadcast %14 : vector<1x96xf32> to vector<16x96xf32>
      %16 = arith.addf %13, %15 : vector<16x96xf32>
      %c0_14 = arith.constant 0 : index
      %c0_15 = arith.constant 0 : index
      %17 = vector.load %arg6[%c0_14, %c0_15] : memref<16x96xf32, #tpu.memory_space<vmem>>, vector<16x96xf32>
      tpu.vector_store %arg6[%c0_14, %c0_15], %16 {strides = array<i32>} : memref<16x96xf32, #tpu.memory_space<vmem>>, vector<16x96xf32>,
    } else {
    }
    return
  }
  func.func @transform_0(%arg0: i32, %arg1: i32, %arg2: i32) -> (i32, i32) {
    %c0_i32 = arith.constant 0 : i32
    return %arg0, %arg2 : i32, i32
  }
  func.func @transform_1(%arg0: i32, %arg1: i32, %arg2: i32) -> (i32, i32) {
    %c0_i32 = arith.constant 0 : i32
    return %arg2, %arg1 : i32, i32
  }
  func.func @transform_2(%arg0: i32, %arg1: i32, %arg2: i32) -> (i32, i32) {
    %c0_i32 = arith.constant 0 : i32
    %c0_i32_0 = arith.constant 0 : i32
    return %c0_i32, %arg1 : i32, i32
  }
  func.func @transform_3(%arg0: i32, %arg1: i32, %arg2: i32) -> (i32, i32) {
    %c0_i32 = arith.constant 0 : i32
    return %arg0, %arg1 : i32, i32
  }
}

module attributes {stable_mosaic.version = 11 : i64} {
  func.func @_attn_batch_kernel(%arg0: i32, %arg1: memref<1x8x96xf32, #tpu.memory_space<vmem>>, %arg2: memref<1x8x32xf32, #tpu.memory_space<vmem>>) attributes {dimension_semantics = [#tpu.dimension_semantics<parallel>], iteration_bounds = array<i64: 2>, scalar_prefetch = 0 : i64, scratch_operands = 0 : i64, tpu.core_type = #tpu.core_type<tc>, window_params = [{transform_indices = @transform_0, window_bounds = array<i64: 1, 8, 96>}, {transform_indices = @transform_1, window_bounds = array<i64: 1, 8, 32>}]} {
    %c0 = arith.constant 0 : index
    %c0_0 = arith.constant 0 : index
    %c0_1 = arith.constant 0 : index
    %0 = vector.load %arg1[%c0, %c0_0, %c0_1] : memref<1x8x96xf32, #tpu.memory_space<vmem>>, vector<1x8x96xf32>
    %1 = vector.shape_cast %0 : vector<1x8x96xf32> to vector<8x96xf32>
    %2 = tpu.iota {dimensions = array<i32: 0>} : vector<8x8xi32>
    %3 = tpu.iota {dimensions = array<i32: 1>} : vector<8x8xi32>
    %4 = arith.cmpi sle, %3, %2 : vector<8x8xi32>
    %5 = vector.extract_strided_slice %1 {offsets = [0, 0], sizes = [8, 16], strides = [1, 1]} : vector<8x96xf32> to vector<8x16xf32>
    %cst = arith.constant 2.500000e-01 : f32
    %6 = vector.broadcast %cst : f32 to vector<8x16xf32>
    %7 = arith.mulf %5, %6 : vector<8x16xf32>
    %8 = arith.truncf %7 : vector<8x16xf32> to vector<8x16xbf16>
    %9 = vector.extract_strided_slice %1 {offsets = [0, 32], sizes = [8, 16], strides = [1, 1]} : vector<8x96xf32> to vector<8x16xf32>
    %10 = arith.truncf %9 : vector<8x16xf32> to vector<8x16xbf16>
    %11 = vector.extract_strided_slice %1 {offsets = [0, 64], sizes = [8, 16], strides = [1, 1]} : vector<8x96xf32> to vector<8x16xf32>
    %12 = arith.truncf %11 : vector<8x16xf32> to vector<8x16xbf16>
    %cst_2 = arith.constant dense<0.000000e+00> : vector<8x8xf32>
    %13 = tpu.matmul %8, %10, %cst_2 {dimension_numbers = #tpu.dot_dimension_numbers<[1], [1], [0], [0], [0, 0, 1, 0], [], []>} : vector<8x16xbf16>, vector<8x16xbf16>, vector<8x8xf32> -> vector<8x8xf32>
    %cst_3 = arith.constant 0xFF800000 : f32
    %14 = vector.broadcast %cst_3 : f32 to vector<8x8xf32>
    %15 = arith.select %4, %13, %14 : vector<8x8xi1>, vector<8x8xf32>
    %cst_4 = arith.constant dense<0xFF800000> : vector<8xf32>
    %16 = vector.multi_reduction <maximumf>, %15, %cst_4 [1] : vector<8x8xf32> to vector<8xf32>
    %17 = vector.shape_cast %16 : vector<8xf32> to vector<8x1xf32>
    %18 = vector.broadcast %17 : vector<8x1xf32> to vector<8x8xf32>
    %19 = arith.subf %15, %18 : vector<8x8xf32>
    %20 = math.exp %19 : vector<8x8xf32>
    %cst_5 = arith.constant dense<0.000000e+00> : vector<8xf32>
    %21 = vector.multi_reduction <add>, %20, %cst_5 [1] : vector<8x8xf32> to vector<8xf32>
    %22 = vector.shape_cast %21 : vector<8xf32> to vector<8x1xf32>
    %23 = tpu.reciprocal %22 : vector<8x1xf32> -> vector<8x1xf32>
    %24 = vector.broadcast %23 : vector<8x1xf32> to vector<8x8xf32>
    %25 = arith.mulf %20, %24 : vector<8x8xf32>
    %26 = arith.truncf %25 : vector<8x8xf32> to vector<8x8xbf16>
    %cst_6 = arith.constant dense<0.000000e+00> : vector<8x16xf32>
    %27 = tpu.matmul %26, %12, %cst_6 {dimension_numbers = #tpu.dot_dimension_numbers<[1], [0], [0], [1], [0, 0, 1, 1], [], []>} : vector<8x8xbf16>, vector<8x16xbf16>, vector<8x16xf32> -> vector<8x16xf32>
    %c0_7 = arith.constant 0 : index
    %c0_8 = arith.constant 0 : index
    %c0_9 = arith.constant 0 : index
    %28 = vector.load %arg2[%c0_7, %c0_8, %c0_9] : memref<1x8x32xf32, #tpu.memory_space<vmem>>, vector<1x8x16xf32>
    %29 = vector.shape_cast %28 : vector<1x8x16xf32> to vector<8x16xf32>
    %30 = vector.shape_cast %27 : vector<8x16xf32> to vector<1x8x16xf32>
    tpu.vector_store %arg2[%c0_7, %c0_8, %c0_9], %30 {strides = array<i32>} : memref<1x8x32xf32, #tpu.memory_space<vmem>>, vector<1x8x16xf32>,
    %31 = vector.extract_strided_slice %1 {offsets = [0, 16], sizes = [8, 16], strides = [1, 1]} : vector<8x96xf32> to vector<8x16xf32>
    %cst_10 = arith.constant 2.500000e-01 : f32
    %32 = vector.broadcast %cst_10 : f32 to vector<8x16xf32>
    %33 = arith.mulf %31, %32 : vector<8x16xf32>
    %34 = arith.truncf %33 : vector<8x16xf32> to vector<8x16xbf16>
    %35 = vector.extract_strided_slice %1 {offsets = [0, 48], sizes = [8, 16], strides = [1, 1]} : vector<8x96xf32> to vector<8x16xf32>
    %36 = arith.truncf %35 : vector<8x16xf32> to vector<8x16xbf16>
    %37 = vector.extract_strided_slice %1 {offsets = [0, 80], sizes = [8, 16], strides = [1, 1]} : vector<8x96xf32> to vector<8x16xf32>
    %38 = arith.truncf %37 : vector<8x16xf32> to vector<8x16xbf16>
    %cst_11 = arith.constant dense<0.000000e+00> : vector<8x8xf32>
    %39 = tpu.matmul %34, %36, %cst_11 {dimension_numbers = #tpu.dot_dimension_numbers<[1], [1], [0], [0], [0, 0, 1, 0], [], []>} : vector<8x16xbf16>, vector<8x16xbf16>, vector<8x8xf32> -> vector<8x8xf32>
    %cst_12 = arith.constant 0xFF800000 : f32
    %40 = vector.broadcast %cst_12 : f32 to vector<8x8xf32>
    %41 = arith.select %4, %39, %40 : vector<8x8xi1>, vector<8x8xf32>
    %cst_13 = arith.constant dense<0xFF800000> : vector<8xf32>
    %42 = vector.multi_reduction <maximumf>, %41, %cst_13 [1] : vector<8x8xf32> to vector<8xf32>
    %43 = vector.shape_cast %42 : vector<8xf32> to vector<8x1xf32>
    %44 = vector.broadcast %43 : vector<8x1xf32> to vector<8x8xf32>
    %45 = arith.subf %41, %44 : vector<8x8xf32>
    %46 = math.exp %45 : vector<8x8xf32>
    %cst_14 = arith.constant dense<0.000000e+00> : vector<8xf32>
    %47 = vector.multi_reduction <add>, %46, %cst_14 [1] : vector<8x8xf32> to vector<8xf32>
    %48 = vector.shape_cast %47 : vector<8xf32> to vector<8x1xf32>
    %49 = tpu.reciprocal %48 : vector<8x1xf32> -> vector<8x1xf32>
    %50 = vector.broadcast %49 : vector<8x1xf32> to vector<8x8xf32>
    %51 = arith.mulf %46, %50 : vector<8x8xf32>
    %52 = arith.truncf %51 : vector<8x8xf32> to vector<8x8xbf16>
    %cst_15 = arith.constant dense<0.000000e+00> : vector<8x16xf32>
    %53 = tpu.matmul %52, %38, %cst_15 {dimension_numbers = #tpu.dot_dimension_numbers<[1], [0], [0], [1], [0, 0, 1, 1], [], []>} : vector<8x8xbf16>, vector<8x16xbf16>, vector<8x16xf32> -> vector<8x16xf32>
    %c0_16 = arith.constant 0 : index
    %c0_17 = arith.constant 0 : index
    %c16 = arith.constant 16 : index
    %54 = vector.load %arg2[%c0_16, %c0_17, %c16] : memref<1x8x32xf32, #tpu.memory_space<vmem>>, vector<1x8x16xf32>
    %55 = vector.shape_cast %54 : vector<1x8x16xf32> to vector<8x16xf32>
    %56 = vector.shape_cast %53 : vector<8x16xf32> to vector<1x8x16xf32>
    tpu.vector_store %arg2[%c0_16, %c0_17, %c16], %56 {strides = array<i32>} : memref<1x8x32xf32, #tpu.memory_space<vmem>>, vector<1x8x16xf32>,
    return
  }
  func.func @transform_0(%arg0: i32) -> (i32, i32, i32) {
    %c0_i32 = arith.constant 0 : i32
    %c0_i32_0 = arith.constant 0 : i32
    %c0_i32_1 = arith.constant 0 : i32
    return %arg0, %c0_i32, %c0_i32_0 : i32, i32, i32
  }
  func.func @transform_1(%arg0: i32) -> (i32, i32, i32) {
    %c0_i32 = arith.constant 0 : i32
    %c0_i32_0 = arith.constant 0 : i32
    %c0_i32_1 = arith.constant 0 : i32
    return %arg0, %c0_i32, %c0_i32_0 : i32, i32, i32
  }
}

module attributes {stable_mosaic.version = 11 : i64} {
  func.func @_proj_ln_kernel(%arg0: i32, %arg1: memref<16x32xf32, #tpu.memory_space<vmem>>, %arg2: memref<32x32xbf16, #tpu.memory_space<vmem>>, %arg3: memref<1x32xf32, #tpu.memory_space<vmem>>, %arg4: memref<16x32xf32, #tpu.memory_space<vmem>>, %arg5: memref<1x32xf32, #tpu.memory_space<vmem>>, %arg6: memref<1x32xf32, #tpu.memory_space<vmem>>, %arg7: memref<16x32xf32, #tpu.memory_space<vmem>>) attributes {dimension_semantics = [#tpu.dimension_semantics<parallel>], iteration_bounds = array<i64: 1>, scalar_prefetch = 0 : i64, scratch_operands = 0 : i64, tpu.core_type = #tpu.core_type<tc>, window_params = [{transform_indices = @transform_0, window_bounds = array<i64: 16, 32>}, {pipeline_mode = #tpu.pipeline_mode<synchronous>, transform_indices = @transform_1, window_bounds = array<i64: 32, 32>}, {pipeline_mode = #tpu.pipeline_mode<synchronous>, transform_indices = @transform_2, window_bounds = array<i64: 1, 32>}, {transform_indices = @transform_3, window_bounds = array<i64: 16, 32>}, {pipeline_mode = #tpu.pipeline_mode<synchronous>, transform_indices = @transform_4, window_bounds = array<i64: 1, 32>}, {pipeline_mode = #tpu.pipeline_mode<synchronous>, transform_indices = @transform_5, window_bounds = array<i64: 1, 32>}, {transform_indices = @transform_6, window_bounds = array<i64: 16, 32>}]} {
    %c0 = arith.constant 0 : index
    %c0_0 = arith.constant 0 : index
    %0 = vector.load %arg1[%c0, %c0_0] : memref<16x32xf32, #tpu.memory_space<vmem>>, vector<16x32xf32>
    %1 = arith.truncf %0 : vector<16x32xf32> to vector<16x32xbf16>
    %c0_1 = arith.constant 0 : index
    %c0_2 = arith.constant 0 : index
    %2 = vector.load %arg2[%c0_1, %c0_2] : memref<32x32xbf16, #tpu.memory_space<vmem>>, vector<32x32xbf16>
    %cst = arith.constant dense<0.000000e+00> : vector<16x32xf32>
    %3 = tpu.matmul %1, %2, %cst {dimension_numbers = #tpu.dot_dimension_numbers<[1], [0], [0], [1], [0, 0, 1, 1], [], []>} : vector<16x32xbf16>, vector<32x32xbf16>, vector<16x32xf32> -> vector<16x32xf32>
    %c0_3 = arith.constant 0 : index
    %c0_4 = arith.constant 0 : index
    %4 = vector.load %arg3[%c0_3, %c0_4] : memref<1x32xf32, #tpu.memory_space<vmem>>, vector<1x32xf32>
    %5 = vector.broadcast %4 : vector<1x32xf32> to vector<16x32xf32>
    %6 = arith.addf %3, %5 : vector<16x32xf32>
    %c0_5 = arith.constant 0 : index
    %c0_6 = arith.constant 0 : index
    %7 = vector.load %arg4[%c0_5, %c0_6] : memref<16x32xf32, #tpu.memory_space<vmem>>, vector<16x32xf32>
    %8 = arith.addf %6, %7 : vector<16x32xf32>
    %cst_7 = arith.constant dense<0.000000e+00> : vector<16xf32>
    %9 = vector.multi_reduction <add>, %8, %cst_7 [1] : vector<16x32xf32> to vector<16xf32>
    %10 = vector.shape_cast %9 : vector<16xf32> to vector<16x1xf32>
    %cst_8 = arith.constant 3.200000e+01 : f32
    %11 = vector.broadcast %cst_8 : f32 to vector<16x1xf32>
    %12 = arith.divf %10, %11 : vector<16x1xf32>
    %13 = vector.broadcast %12 : vector<16x1xf32> to vector<16x32xf32>
    %14 = arith.subf %8, %13 : vector<16x32xf32>
    %15 = arith.mulf %14, %14 : vector<16x32xf32>
    %cst_9 = arith.constant dense<0.000000e+00> : vector<16xf32>
    %16 = vector.multi_reduction <add>, %15, %cst_9 [1] : vector<16x32xf32> to vector<16xf32>
    %17 = vector.shape_cast %16 : vector<16xf32> to vector<16x1xf32>
    %cst_10 = arith.constant 3.200000e+01 : f32
    %18 = vector.broadcast %cst_10 : f32 to vector<16x1xf32>
    %19 = arith.divf %17, %18 : vector<16x1xf32>
    %20 = vector.broadcast %12 : vector<16x1xf32> to vector<16x32xf32>
    %21 = arith.subf %8, %20 : vector<16x32xf32>
    %cst_11 = arith.constant 9.99999974E-6 : f32
    %22 = vector.broadcast %cst_11 : f32 to vector<16x1xf32>
    %23 = arith.addf %19, %22 : vector<16x1xf32>
    %24 = math.rsqrt %23 : vector<16x1xf32>
    %25 = vector.broadcast %24 : vector<16x1xf32> to vector<16x32xf32>
    %26 = arith.mulf %21, %25 : vector<16x32xf32>
    %c0_12 = arith.constant 0 : index
    %c0_13 = arith.constant 0 : index
    %27 = vector.load %arg5[%c0_12, %c0_13] : memref<1x32xf32, #tpu.memory_space<vmem>>, vector<1x32xf32>
    %28 = vector.broadcast %27 : vector<1x32xf32> to vector<16x32xf32>
    %29 = arith.mulf %26, %28 : vector<16x32xf32>
    %c0_14 = arith.constant 0 : index
    %c0_15 = arith.constant 0 : index
    %30 = vector.load %arg6[%c0_14, %c0_15] : memref<1x32xf32, #tpu.memory_space<vmem>>, vector<1x32xf32>
    %31 = vector.broadcast %30 : vector<1x32xf32> to vector<16x32xf32>
    %32 = arith.addf %29, %31 : vector<16x32xf32>
    %c0_16 = arith.constant 0 : index
    %c0_17 = arith.constant 0 : index
    %33 = vector.load %arg7[%c0_16, %c0_17] : memref<16x32xf32, #tpu.memory_space<vmem>>, vector<16x32xf32>
    tpu.vector_store %arg7[%c0_16, %c0_17], %32 {strides = array<i32>} : memref<16x32xf32, #tpu.memory_space<vmem>>, vector<16x32xf32>,
    return
  }
  func.func @transform_0(%arg0: i32) -> (i32, i32) {
    %c0_i32 = arith.constant 0 : i32
    %c0_i32_0 = arith.constant 0 : i32
    return %arg0, %c0_i32 : i32, i32
  }
  func.func @transform_1(%arg0: i32) -> (i32, i32) {
    %c0_i32 = arith.constant 0 : i32
    %c0_i32_0 = arith.constant 0 : i32
    %c0_i32_1 = arith.constant 0 : i32
    return %c0_i32, %c0_i32_0 : i32, i32
  }
  func.func @transform_2(%arg0: i32) -> (i32, i32) {
    %c0_i32 = arith.constant 0 : i32
    %c0_i32_0 = arith.constant 0 : i32
    %c0_i32_1 = arith.constant 0 : i32
    return %c0_i32, %c0_i32_0 : i32, i32
  }
  func.func @transform_3(%arg0: i32) -> (i32, i32) {
    %c0_i32 = arith.constant 0 : i32
    %c0_i32_0 = arith.constant 0 : i32
    return %arg0, %c0_i32 : i32, i32
  }
  func.func @transform_4(%arg0: i32) -> (i32, i32) {
    %c0_i32 = arith.constant 0 : i32
    %c0_i32_0 = arith.constant 0 : i32
    %c0_i32_1 = arith.constant 0 : i32
    return %c0_i32, %c0_i32_0 : i32, i32
  }
  func.func @transform_5(%arg0: i32) -> (i32, i32) {
    %c0_i32 = arith.constant 0 : i32
    %c0_i32_0 = arith.constant 0 : i32
    %c0_i32_1 = arith.constant 0 : i32
    return %c0_i32, %c0_i32_0 : i32, i32
  }
  func.func @transform_6(%arg0: i32) -> (i32, i32) {
    %c0_i32 = arith.constant 0 : i32
    %c0_i32_0 = arith.constant 0 : i32
    return %arg0, %c0_i32 : i32, i32
  }
}

module attributes {stable_mosaic.version = 11 : i64} {
  func.func @_ffn_ln_kernel(%arg0: i32, %arg1: i32, %arg2: memref<16x32xf32, #tpu.memory_space<vmem>>, %arg3: memref<32x256xbf16, #tpu.memory_space<vmem>>, %arg4: memref<1x256xf32, #tpu.memory_space<vmem>>, %arg5: memref<256x32xbf16, #tpu.memory_space<vmem>>, %arg6: memref<1x32xf32, #tpu.memory_space<vmem>>, %arg7: memref<1x32xf32, #tpu.memory_space<vmem>>, %arg8: memref<1x32xf32, #tpu.memory_space<vmem>>, %arg9: memref<16x32xf32, #tpu.memory_space<vmem>>, %arg10: memref<16x32xf32, #tpu.memory_space<vmem>>) attributes {dimension_semantics = [#tpu.dimension_semantics<parallel>, #tpu.dimension_semantics<arbitrary>], iteration_bounds = array<i64: 1, 1>, scalar_prefetch = 0 : i64, scratch_operands = 1 : i64, tpu.core_type = #tpu.core_type<tc>, window_params = [{transform_indices = @transform_0, window_bounds = array<i64: 16, 32>}, {transform_indices = @transform_1, window_bounds = array<i64: 32, 256>}, {transform_indices = @transform_2, window_bounds = array<i64: 1, 256>}, {transform_indices = @transform_3, window_bounds = array<i64: 256, 32>}, {pipeline_mode = #tpu.pipeline_mode<synchronous>, transform_indices = @transform_4, window_bounds = array<i64: 1, 32>}, {pipeline_mode = #tpu.pipeline_mode<synchronous>, transform_indices = @transform_5, window_bounds = array<i64: 1, 32>}, {pipeline_mode = #tpu.pipeline_mode<synchronous>, transform_indices = @transform_6, window_bounds = array<i64: 1, 32>}, {transform_indices = @transform_7, window_bounds = array<i64: 16, 32>}]} {
    %c0_i32 = arith.constant 0 : i32
    %0 = arith.cmpi eq, %arg1, %c0_i32 : i32
    %1 = arith.extui %0 : i1 to i32
    %c0_i32_0 = arith.constant 0 : i32
    %2 = arith.cmpi ne, %1, %c0_i32_0 : i32
    scf.if %2 {
      %cst_16 = arith.constant 0.000000e+00 : f32
      %21 = vector.broadcast %cst_16 : f32 to vector<16x32xf32>
      %c0_17 = arith.constant 0 : index
      %c0_18 = arith.constant 0 : index
      %22 = vector.load %arg10[%c0_17, %c0_18] : memref<16x32xf32, #tpu.memory_space<vmem>>, vector<16x32xf32>
      tpu.vector_store %arg10[%c0_17, %c0_18], %21 {strides = array<i32>} : memref<16x32xf32, #tpu.memory_space<vmem>>, vector<16x32xf32>,
    } else {
    }
    %c0 = arith.constant 0 : index
    %c0_1 = arith.constant 0 : index
    %3 = vector.load %arg2[%c0, %c0_1] : memref<16x32xf32, #tpu.memory_space<vmem>>, vector<16x32xf32>
    %4 = arith.truncf %3 : vector<16x32xf32> to vector<16x32xbf16>
    %c0_2 = arith.constant 0 : index
    %c0_3 = arith.constant 0 : index
    %5 = vector.load %arg3[%c0_2, %c0_3] : memref<32x256xbf16, #tpu.memory_space<vmem>>, vector<32x256xbf16>
    %cst = arith.constant dense<0.000000e+00> : vector<16x256xf32>
    %6 = tpu.matmul %4, %5, %cst {dimension_numbers = #tpu.dot_dimension_numbers<[1], [0], [0], [1], [0, 0, 1, 1], [], []>} : vector<16x32xbf16>, vector<32x256xbf16>, vector<16x256xf32> -> vector<16x256xf32>
    %c0_4 = arith.constant 0 : index
    %c0_5 = arith.constant 0 : index
    %7 = vector.load %arg4[%c0_4, %c0_5] : memref<1x256xf32, #tpu.memory_space<vmem>>, vector<1x256xf32>
    %8 = vector.broadcast %7 : vector<1x256xf32> to vector<16x256xf32>
    %9 = arith.addf %6, %8 : vector<16x256xf32>
    %cst_6 = arith.constant 0.000000e+00 : f32
    %10 = vector.broadcast %cst_6 : f32 to vector<16x256xf32>
    %11 = arith.maximumf %9, %10 : vector<16x256xf32>
    %c0_7 = arith.constant 0 : index
    %c0_8 = arith.constant 0 : index
    %12 = vector.load %arg10[%c0_7, %c0_8] : memref<16x32xf32, #tpu.memory_space<vmem>>, vector<16x32xf32>
    %13 = arith.truncf %11 : vector<16x256xf32> to vector<16x256xbf16>
    %c0_9 = arith.constant 0 : index
    %c0_10 = arith.constant 0 : index
    %14 = vector.load %arg5[%c0_9, %c0_10] : memref<256x32xbf16, #tpu.memory_space<vmem>>, vector<256x32xbf16>
    %cst_11 = arith.constant dense<0.000000e+00> : vector<16x32xf32>
    %15 = tpu.matmul %13, %14, %cst_11 {dimension_numbers = #tpu.dot_dimension_numbers<[1], [0], [0], [1], [0, 0, 1, 1], [], []>} : vector<16x256xbf16>, vector<256x32xbf16>, vector<16x32xf32> -> vector<16x32xf32>
    %16 = arith.addf %12, %15 : vector<16x32xf32>
    %c0_12 = arith.constant 0 : index
    %c0_13 = arith.constant 0 : index
    %17 = vector.load %arg10[%c0_12, %c0_13] : memref<16x32xf32, #tpu.memory_space<vmem>>, vector<16x32xf32>
    tpu.vector_store %arg10[%c0_12, %c0_13], %16 {strides = array<i32>} : memref<16x32xf32, #tpu.memory_space<vmem>>, vector<16x32xf32>,
    %c0_i32_14 = arith.constant 0 : i32
    %18 = arith.cmpi eq, %arg1, %c0_i32_14 : i32
    %19 = arith.extui %18 : i1 to i32
    %c0_i32_15 = arith.constant 0 : i32
    %20 = arith.cmpi ne, %19, %c0_i32_15 : i32
    scf.if %20 {
      %c0_16 = arith.constant 0 : index
      %c0_17 = arith.constant 0 : index
      %21 = vector.load %arg10[%c0_16, %c0_17] : memref<16x32xf32, #tpu.memory_space<vmem>>, vector<16x32xf32>
      %22 = arith.addf %3, %21 : vector<16x32xf32>
      %c0_18 = arith.constant 0 : index
      %c0_19 = arith.constant 0 : index
      %23 = vector.load %arg6[%c0_18, %c0_19] : memref<1x32xf32, #tpu.memory_space<vmem>>, vector<1x32xf32>
      %24 = vector.broadcast %23 : vector<1x32xf32> to vector<16x32xf32>
      %25 = arith.addf %22, %24 : vector<16x32xf32>
      %cst_20 = arith.constant dense<0.000000e+00> : vector<16xf32>
      %26 = vector.multi_reduction <add>, %25, %cst_20 [1] : vector<16x32xf32> to vector<16xf32>
      %27 = vector.shape_cast %26 : vector<16xf32> to vector<16x1xf32>
      %cst_21 = arith.constant 3.200000e+01 : f32
      %28 = vector.broadcast %cst_21 : f32 to vector<16x1xf32>
      %29 = arith.divf %27, %28 : vector<16x1xf32>
      %30 = vector.broadcast %29 : vector<16x1xf32> to vector<16x32xf32>
      %31 = arith.subf %25, %30 : vector<16x32xf32>
      %32 = arith.mulf %31, %31 : vector<16x32xf32>
      %cst_22 = arith.constant dense<0.000000e+00> : vector<16xf32>
      %33 = vector.multi_reduction <add>, %32, %cst_22 [1] : vector<16x32xf32> to vector<16xf32>
      %34 = vector.shape_cast %33 : vector<16xf32> to vector<16x1xf32>
      %cst_23 = arith.constant 3.200000e+01 : f32
      %35 = vector.broadcast %cst_23 : f32 to vector<16x1xf32>
      %36 = arith.divf %34, %35 : vector<16x1xf32>
      %37 = vector.broadcast %29 : vector<16x1xf32> to vector<16x32xf32>
      %38 = arith.subf %25, %37 : vector<16x32xf32>
      %cst_24 = arith.constant 9.99999974E-6 : f32
      %39 = vector.broadcast %cst_24 : f32 to vector<16x1xf32>
      %40 = arith.addf %36, %39 : vector<16x1xf32>
      %41 = math.rsqrt %40 : vector<16x1xf32>
      %42 = vector.broadcast %41 : vector<16x1xf32> to vector<16x32xf32>
      %43 = arith.mulf %38, %42 : vector<16x32xf32>
      %c0_25 = arith.constant 0 : index
      %c0_26 = arith.constant 0 : index
      %44 = vector.load %arg7[%c0_25, %c0_26] : memref<1x32xf32, #tpu.memory_space<vmem>>, vector<1x32xf32>
      %45 = vector.broadcast %44 : vector<1x32xf32> to vector<16x32xf32>
      %46 = arith.mulf %43, %45 : vector<16x32xf32>
      %c0_27 = arith.constant 0 : index
      %c0_28 = arith.constant 0 : index
      %47 = vector.load %arg8[%c0_27, %c0_28] : memref<1x32xf32, #tpu.memory_space<vmem>>, vector<1x32xf32>
      %48 = vector.broadcast %47 : vector<1x32xf32> to vector<16x32xf32>
      %49 = arith.addf %46, %48 : vector<16x32xf32>
      %c0_29 = arith.constant 0 : index
      %c0_30 = arith.constant 0 : index
      %50 = vector.load %arg9[%c0_29, %c0_30] : memref<16x32xf32, #tpu.memory_space<vmem>>, vector<16x32xf32>
      tpu.vector_store %arg9[%c0_29, %c0_30], %49 {strides = array<i32>} : memref<16x32xf32, #tpu.memory_space<vmem>>, vector<16x32xf32>,
    } else {
    }
    return
  }
  func.func @transform_0(%arg0: i32, %arg1: i32) -> (i32, i32) {
    %c0_i32 = arith.constant 0 : i32
    %c0_i32_0 = arith.constant 0 : i32
    return %arg0, %c0_i32 : i32, i32
  }
  func.func @transform_1(%arg0: i32, %arg1: i32) -> (i32, i32) {
    %c0_i32 = arith.constant 0 : i32
    %c0_i32_0 = arith.constant 0 : i32
    return %c0_i32, %arg1 : i32, i32
  }
  func.func @transform_2(%arg0: i32, %arg1: i32) -> (i32, i32) {
    %c0_i32 = arith.constant 0 : i32
    %c0_i32_0 = arith.constant 0 : i32
    return %c0_i32, %arg1 : i32, i32
  }
  func.func @transform_3(%arg0: i32, %arg1: i32) -> (i32, i32) {
    %c0_i32 = arith.constant 0 : i32
    %c0_i32_0 = arith.constant 0 : i32
    return %arg1, %c0_i32 : i32, i32
  }
  func.func @transform_4(%arg0: i32, %arg1: i32) -> (i32, i32) {
    %c0_i32 = arith.constant 0 : i32
    %c0_i32_0 = arith.constant 0 : i32
    %c0_i32_1 = arith.constant 0 : i32
    return %c0_i32, %c0_i32_0 : i32, i32
  }
  func.func @transform_5(%arg0: i32, %arg1: i32) -> (i32, i32) {
    %c0_i32 = arith.constant 0 : i32
    %c0_i32_0 = arith.constant 0 : i32
    %c0_i32_1 = arith.constant 0 : i32
    return %c0_i32, %c0_i32_0 : i32, i32
  }
  func.func @transform_6(%arg0: i32, %arg1: i32) -> (i32, i32) {
    %c0_i32 = arith.constant 0 : i32
    %c0_i32_0 = arith.constant 0 : i32
    %c0_i32_1 = arith.constant 0 : i32
    return %c0_i32, %c0_i32_0 : i32, i32
  }
  func.func @transform_7(%arg0: i32, %arg1: i32) -> (i32, i32) {
    %c0_i32 = arith.constant 0 : i32
    %c0_i32_0 = arith.constant 0 : i32
    return %arg0, %c0_i32 : i32, i32
  }
}

module attributes {stable_mosaic.version = 11 : i64} {
  func.func @_decoder_kernel(%arg0: i32, %arg1: i32, %arg2: i32, %arg3: memref<1x8x32xf32, #tpu.memory_space<vmem>>, %arg4: memref<32x128xbf16, #tpu.memory_space<vmem>>, %arg5: memref<1x128xf32, #tpu.memory_space<vmem>>, %arg6: memref<8x128xf32, #tpu.memory_space<vmem>>) attributes {dimension_semantics = [#tpu.dimension_semantics<parallel>, #tpu.dimension_semantics<parallel>, #tpu.dimension_semantics<parallel>], iteration_bounds = array<i64: 1, 2, 1>, scalar_prefetch = 0 : i64, scratch_operands = 0 : i64, tpu.core_type = #tpu.core_type<tc>, window_params = [{transform_indices = @transform_0, window_bounds = array<i64: 1, 8, 32>}, {transform_indices = @transform_1, window_bounds = array<i64: 32, 128>}, {transform_indices = @transform_2, window_bounds = array<i64: 1, 128>}, {transform_indices = @transform_3, window_bounds = array<i64: 8, 128>}]} {
    %c0 = arith.constant 0 : index
    %c0_0 = arith.constant 0 : index
    %c0_1 = arith.constant 0 : index
    %0 = vector.load %arg3[%c0, %c0_0, %c0_1] : memref<1x8x32xf32, #tpu.memory_space<vmem>>, vector<1x8x32xf32>
    %1 = vector.shape_cast %0 : vector<1x8x32xf32> to vector<8x32xf32>
    %2 = arith.truncf %1 : vector<8x32xf32> to vector<8x32xbf16>
    %c0_2 = arith.constant 0 : index
    %c0_3 = arith.constant 0 : index
    %3 = vector.load %arg4[%c0_2, %c0_3] : memref<32x128xbf16, #tpu.memory_space<vmem>>, vector<32x128xbf16>
    %cst = arith.constant dense<0.000000e+00> : vector<8x128xf32>
    %4 = tpu.matmul %2, %3, %cst {dimension_numbers = #tpu.dot_dimension_numbers<[1], [0], [0], [1], [0, 0, 1, 1], [], []>} : vector<8x32xbf16>, vector<32x128xbf16>, vector<8x128xf32> -> vector<8x128xf32>
    %c0_4 = arith.constant 0 : index
    %c0_5 = arith.constant 0 : index
    %5 = vector.load %arg5[%c0_4, %c0_5] : memref<1x128xf32, #tpu.memory_space<vmem>>, vector<1x128xf32>
    %6 = vector.broadcast %5 : vector<1x128xf32> to vector<8x128xf32>
    %7 = arith.addf %4, %6 : vector<8x128xf32>
    %c0_6 = arith.constant 0 : index
    %c0_7 = arith.constant 0 : index
    %8 = vector.load %arg6[%c0_6, %c0_7] : memref<8x128xf32, #tpu.memory_space<vmem>>, vector<8x128xf32>
    tpu.vector_store %arg6[%c0_6, %c0_7], %7 {strides = array<i32>} : memref<8x128xf32, #tpu.memory_space<vmem>>, vector<8x128xf32>,
    return
  }
  func.func @transform_0(%arg0: i32, %arg1: i32, %arg2: i32) -> (i32, i32, i32) {
    %c0_i32 = arith.constant 0 : i32
    %c0_i32_0 = arith.constant 0 : i32
    return %arg1, %arg0, %c0_i32 : i32, i32, i32
  }
  func.func @transform_1(%arg0: i32, %arg1: i32, %arg2: i32) -> (i32, i32) {
    %c0_i32 = arith.constant 0 : i32
    %c0_i32_0 = arith.constant 0 : i32
    return %c0_i32, %arg2 : i32, i32
  }
  func.func @transform_2(%arg0: i32, %arg1: i32, %arg2: i32) -> (i32, i32) {
    %c0_i32 = arith.constant 0 : i32
    %c0_i32_0 = arith.constant 0 : i32
    return %c0_i32, %arg2 : i32, i32
  }
  func.func @transform_3(%arg0: i32, %arg1: i32, %arg2: i32) -> (i32, i32) {
    %c1_i32 = arith.constant 1 : i32
    %0 = arith.muli %arg1, %c1_i32 : i32
    %1 = arith.addi %0, %arg2 : i32
    %c0_i32 = arith.constant 0 : i32
    return %arg0, %1 : i32, i32
  }
}

</mosaic_0001>

<bundles_post_ra>
// kernel: transformer_model.9
= control target key start
LH: loop header
LB: loop body
LE: loop exit
PB: predicated region body
PF: predicated region fallthrough
CT: control target
= control target key end

     0   :  { %vm19_vm0 = vcmask 785408   ;;  %v132_v0 = vmov 0.0   ;;  %vm133_vm1 = vmmov 0   ;;  %vm43_vm2 = vcmask 261120   ;;  %s181_s1 = inlined_call_operand.vmem [shape: bf16[32,96], index: 1, kind: input, shape index: {}]   ;;  %s182_s0 = inlined_call_operand.vmem [shape: f32[16,32], index: 0, kind: input, shape index: {}]   ;;  %s183_s2 = inlined_call_operand.vmem [shape: f32[1,96], index: 2, kind: input, shape index: {}]   ;;  %s184_s3 = inlined_call_operand.vmem [shape: f32[16,96], index: 3, kind: output, shape index: {}]  }
   0x1   :  { %120 = vmatprep.subr.bf16.mxu0 %v132_v0  ;;  %v130_v1 = vld [vmem:[%s181_s1] sm:$0xff]   ;;  %124 = vmatprep.mubr.msk.bf16.mxu0 %vm133_vm1, %v132_v0  ;;  %20 = vst.msk [vmem:[#allocation2] sm:$0xff] %vm19_vm0, %v132_v0  ;;  %21 = vst.msk [vmem:[#allocation2 + $0x8] sm:$0xff] %vm19_vm0, %v132_v0  ;;  %v131_v2 = vld [vmem:[%s181_s1 + $0x8] sm:$0xff]  }
   0x2   :  { %121 = vmatpush3.bf16.msra.mxu0 %v130_v1  ;;  %v24_v3 = vld [vmem:[%s182_s0] sm:$0xff]  ;;  %v25_v4 = vld [vmem:[%s182_s0 + $0x8] sm:$0xff] }
   0x3   :  { %122 = vmatprep.subr.bf16.mxu0 %v132_v0  ;;  %v26_v5 = vpack.c.bf16 %v25_v4, %v24_v3  ;;  %v116_v14 = vld [vmem:[%s183_s2] ss:$0 sm:$0xff] }
   0x6   :  { %123 = vmatpush3.bf16.msra.mxu0 %v131_v2 }
   0x8   :  { %v22_v6 = vld [vmem:[#allocation2] sm:$0xff]  ;;  %v23_v8 = vld [vmem:[#allocation2 + $0x8] sm:$0xff] }
   0x9   :  { %125 = vmatmul.mubr.msk.bf16.vlgmr.msra.gmra.mrb[0].mxu0 %vm43_vm2, %v26_v5 }
  0xdc   :  { %v81_v7 = vpop.f32.mrb[0].mxu0 }
  0xdd   :  { %v88_v9 = vadd.f32 %v81_v7, %v22_v6  ;;  %v126_v10 = vpop.f32.mrb[1].mxu0 }
  0xde   :  { %v84_v11 = vpop.f32.mrb[2].mxu0 }
  0xdf   :  { %91 = vst.msk [vmem:[#allocation2] sm:$0xff] %vm19_vm0, %v88_v9  ;;  %v89_v12 = vadd.f32 %v84_v11, %v23_v8  ;;  %v127_v13 = vpop.f32.mrb[3].mxu0 }
  0xe1   :  { %92 = vst.msk [vmem:[#allocation2 + $0x8] sm:$0xff] %vm19_vm0, %v89_v12 }
  0xe6   :  { %v96_v15 = vld [vmem:[#allocation2] sm:$0xff] }
  0xe7   :  { %v105_v16 = vadd.f32 %v116_v14, %v96_v15 }
  0xe8   :  { %v97_v17 = vld [vmem:[#allocation2 + $0x8] sm:$0xff] }
  0xe9   :  { %107 = vst.msk [vmem:[%s184_s3] sm:$0xff] %vm19_vm0, %v105_v16  ;;  %v106_v18 = vadd.f32 %v116_v14, %v97_v17 }
  0xeb   :  { %108 = vst.msk [vmem:[%s184_s3 + $0x8] sm:$0xff] %vm19_vm0, %v106_v18 }

// kernel: transformer_model.10
= control target key start
LH: loop header
LB: loop body
LE: loop exit
PB: predicated region body
PF: predicated region fallthrough
CT: control target
= control target key end

     0   :  { %s502_s6 = smov 0   ;;  %s555_s0 = inlined_call_operand.vmem [shape: f32[2,8,96], index: 0, kind: input, shape index: {}]   ;;  %s556_s1 = inlined_call_operand.vmem [shape: f32[2,8,32], index: 1, kind: output, shape index: {}]  }
   0x1 LB: > { %s407_s7 = sadd.s32 4294967295, %s482_s6   ;;  %p411_p0 = scmp.ge.s32.totalorder %s482_s6, 1  ;;  %s482_s6 = sphi %s502_s6, %s11_s6  }
   0x2   : > { %p86_p1 = scmp.lt.s32.totalorder %s482_s6, 3 }
   0x4   : > { %p87_p2 = pnand %p411_p0, %p86_p1 }
   0x5   : > { %p104_p3 = scmp.lt.s32.totalorder (!%p87_p2), %s407_s7, 1  ;;  %v484_v0 = vmov (!%p87_p2), 0.0   ;;  %vm485_vm0 = vmmov (!%p87_p2), 0   ;;  %s486_s12 = smov (!%p87_p2), 96   ;;  %vm125_vm1 = vcmask (!%p87_p2), 130048   ;;  %v114_v7 = vlaneseq (!%p87_p2) }
   0x6   : > { %90 = sbr.rel (%p87_p2) target bundleno = 1536 (0x600), region = 24  ;;  %428 = vmatprep.subr.bf16.mxu0 (!%p87_p2), %v484_v0  ;;  %430 = vmatprep.mubr.msk.bf16.mxu0 (!%p87_p2), %vm485_vm0, %v484_v0  ;;  %s487_s13 = smov (!%p87_p2), 64   ;;  %vm173_vm3 = vcmask (!%p87_p2), 64512   ;;  %vm191_vm4 = vcmask (!%p87_p2), 1043456   ;;  %vm352_vm5 = vcmask (!%p87_p2), 261248  }
   0x7   : > { %434 = vmatprep.subr.bf16.mxu1 (!%p87_p2), %v484_v0  ;;  %436 = vmatprep.mubr.msk.bf16.mxu1 (!%p87_p2), %vm485_vm0, %v484_v0  ;;  %v115_v8 = vshrl.u32 (!%p87_p2), %v114_v7, 7  ;;  %v117_v9 = vand.u32 (!%p87_p2), 127, %v114_v7  ;;  %s488_s14 = smov (!%p87_p2), 80   ;;  %s489_s15 = smov (!%p87_p2), 112  }
   0x8   : > { %s490_s19 = smov (!%p87_p2), 48   ;;  %s491_s20 = smov (!%p87_p2), 16  }
   0x9   : > { %vm118_vm2 = vcmp.le.s32.totalorder (!%p87_p2), %v117_v9, %v115_v8 }
   0xd   : > { %s558_s7 = smov (!%p104_p3, %s407_s7), 1 }
   0xe   : > { %s412_s8 = sshll.u32 %s558_s7, 3 }
   0xf   : > { %s107_s11 = scalar_lea.vmem %s555_s0, %s412_s8  ;;  %s541_s18 = scalar_lea.vmem %s556_s1, %s412_s8 }
  0x10   : > { %v113_v1 = vld [vmem:[%s107_s11] sm:$0xff] }
  0x11   : > { %v520_v2 = vpack.c.bf16 %v113_v1, %v113_v1  ;;  %v119_v5 = vmul.f32 0.25, %v113_v1 }
  0x13   : > { %123 = vrot.lane.b32.xlu0 %v520_v2, %s486_s12  ;;  %v120_v6 = vpack.c.bf16 %v119_v5, %v119_v5  ;;  %186 = vrot.lane.b32.xlu1 %v520_v2, %s487_s13 }
  0x85   : > { %v124_v3 = vpop.permute.xlu0 %123  ;;  %v187_v16 = vpop.permute.xlu1 %186 }
  0x86   : > { %v130_v4 = vsel %vm125_vm1, %v124_v3, 0  ;;  %v193_v17 = vsel %vm191_vm4, %v187_v16, 0 }
  0x87   : > { %429 = vmatpush3.bf16.xpose.msra.mxu0 %v130_v4  ;;  %435 = vmatpush3.bf16.msra.mxu1 %v193_v17 }
  0x88   : > { %446 = vmatprep.subr.bf16.mxu0 %v484_v0  ;;  %440 = vmatprep.subr.bf16.mxu1 %v484_v0 }
  0x8e   : > { %431 = vmatmul.mubr.msk.bf16.vlgmr.msra.gmra.mrb[0].mxu0 %vm125_vm1, %v120_v6 }
  0x8f   : > { %448 = vmatprep.mubr.msk.bf16.mxu0 %vm485_vm0, %v484_v0 }
 0x161   : > { %v166_v10 = vpop.f32.mrb[0].mxu0 }
 0x162   : > { %v172_v11 = vsel %vm118_vm2, %v166_v10, -inf  ;;  %v432_v12 = vpop.f32.mrb[1].mxu0 }
 0x163   : > { %v169_v13 = vpop.f32.mrb[2].mxu0  ;;  %v174_v14 = vsel %vm173_vm3, %v172_v11, -inf }
 0x164   : > { %175 = vmax.xlane.f32.xlu0 %v174_v14  ;;  %v433_v15 = vpop.f32.mrb[3].mxu0 }
 0x1f1   : > { %v176_v18 = vpop.xlane.xlu0 %175 }
 0x1f2   : > { %v177_v19 = vsub.f32 %v172_v11, %v176_v18 }
 0x1f4   : > { %v178_v20 = vmul.f32 1.442695, %v177_v19 }
 0x1f6   : > { %468 = vpow2.f32 %v178_v20 }
 0x200   : > { %v469_v21 = vpop.eup %468 }
 0x201   : > { %v180_v22 = vsel %vm173_vm3, %v469_v21, 0.0 }
 0x202   : > { %181 = vadd.xlane.f32.xlu1 %v180_v22 }
 0x213   : > { %239 = vrot.lane.b32.xlu1 %v520_v2, %s488_s14 }
 0x217   : > { %237 = vrot.lane.b32.xlu1 %v120_v6, %s489_s15 }
 0x28f   : > { %v182_v23 = vpop.xlane.xlu1 %181 }
 0x290   : > { %470 = vrcp.f32 %v182_v23 }
 0x293   : > { %v240_v25 = vpop.permute.xlu1 %239 }
 0x294   : > { %v245_v27 = vsel %vm125_vm1, %v240_v25, 0 }
 0x297   : > { %v238_v29 = vpop.permute.xlu1 %237 }
 0x29a   : > { %v471_v24 = vpop.eup %470 }
 0x29b   : > { %v184_v26 = vmul.f32 %v471_v24, %v469_v21 }
 0x29d   : > { %v185_v28 = vpack.c.bf16 %v184_v26, %v184_v26 }
 0x29f   : > { %437 = vmatmul.mubr.msk.bf16.vlgmr.msra.gmra.mrb[0].mxu1 %vm173_vm3, %v185_v28 }
 0x2a0   : > { %441 = vmatpush3.bf16.xpose.msra.mxu1 %v245_v27  ;;  %442 = vmatprep.mubr.msk.bf16.mxu1 %vm485_vm0, %v484_v0 }
 0x2a7   : > { %443 = vmatmul.mubr.msk.bf16.vlgmr.msra.gmra.mrb[4].mxu1 %vm125_vm1, %v238_v29 }
 0x372   : > { %v229_v30 = vpop.f32.mrb[0].mxu1 }
 0x373   : > { %235 = vst.msk [vmem:[%s541_s18] sm:$0xff] %vm125_vm1, %v229_v30  ;;  %v438_v31 = vpop.f32.mrb[1].mxu1 }
 0x374   : > { %v232_v32 = vpop.f32.mrb[2].mxu1 }
 0x375   : > { %v439_v33 = vpop.f32.mrb[3].mxu1 }
 0x37a   : > { %v281_v34 = vpop.f32.mrb[4].mxu1 }
 0x37b   : > { %v287_v35 = vsel %vm118_vm2, %v281_v34, -inf  ;;  %v444_v36 = vpop.f32.mrb[5].mxu1 }
 0x37c   : > { %v284_v37 = vpop.f32.mrb[6].mxu1  ;;  %v288_v38 = vsel %vm173_vm3, %v287_v35, -inf }
 0x37d   : > { %289 = vmax.xlane.f32.xlu1 %v288_v38  ;;  %v445_v39 = vpop.f32.mrb[7].mxu1 }
 0x40a   : > { %v290_v40 = vpop.xlane.xlu1 %289 }
 0x40b   : > { %v291_v41 = vsub.f32 %v287_v35, %v290_v40 }
 0x40d   : > { %v292_v42 = vmul.f32 1.442695, %v291_v41 }
 0x40f   : > { %472 = vpow2.f32 %v292_v42 }
 0x419   : > { %v473_v43 = vpop.eup %472 }
 0x41a   : > { %v294_v44 = vsel %vm173_vm3, %v473_v43, 0.0 }
 0x41b   : > { %295 = vadd.xlane.f32.xlu0 %v294_v44 }
 0x431   : > { %300 = vrot.lane.b32.xlu0 %v520_v2, %s490_s19 }
 0x4a8   : > { %v296_v45 = vpop.xlane.xlu0 %295 }
 0x4a9   : > { %474 = vrcp.f32 %v296_v45 }
 0x4ac   : > { %v301_v46 = vpop.permute.xlu0 %300 }
 0x4ad   : > { %v306_v47 = vsel %vm191_vm4, %v301_v46, 0 }
 0x4ae   : > { %447 = vmatpush3.bf16.msra.mxu0 %v306_v47 }
 0x4b3   : > { %v475_v48 = vpop.eup %474 }
 0x4b4   : > { %v298_v49 = vmul.f32 %v475_v48, %v473_v43 }
 0x4b6   : > { %v299_v50 = vpack.c.bf16 %v298_v49, %v298_v49 }
 0x4b8   : > { %449 = vmatmul.mubr.msk.bf16.vlgmr.msra.gmra.mrb[4].mxu0 %vm173_vm3, %v299_v50 }
 0x58b   : > { %v342_v51 = vpop.f32.mrb[4].mxu0 }
 0x58c   : > { %349 = vrot.lane.b32.xlu0 %v342_v51, %s491_s20  ;;  %v450_v52 = vpop.f32.mrb[5].mxu0 }
 0x58d   : > { %v345_v53 = vpop.f32.mrb[6].mxu0 }
 0x58e   : > { %v451_v54 = vpop.f32.mrb[7].mxu0 }
 0x5fe   : > { %v350_v55 = vpop.permute.xlu0 %349 }
 0x5ff   : > { %353 = vst.msk [vmem:[%s541_s18] sm:$0xff] %vm352_vm5, %v350_v55 }
 0x600 PF: > { %s11_s6 = sadd.s32 1, %s482_s6  }
 0x601   : > { %p8_p4 = scmp.ge.s32.totalorder %s11_s6, 4  }
 0x603   :  { %10 = sbr.rel (!%p8_p4) target bundleno = 1 (0x1), region = 54 }

// kernel: transformer_model.11
= control target key start
LH: loop header
LB: loop body
LE: loop exit
PB: predicated region body
PF: predicated region fallthrough
CT: control target
= control target key end

     0   :  { %v175_v0 = vmov 0.0   ;;  %vm176_vm0 = vmmov 0   ;;  %vm50_vm1 = vcmask 261120   ;;  %s252_s1 = inlined_call_operand.vmem [shape: bf16[32,32], index: 1, kind: input, shape index: {}]   ;;  %s253_s0 = inlined_call_operand.vmem [shape: f32[16,32], index: 0, kind: input, shape index: {}]   ;;  %s254_s2 = inlined_call_operand.vmem [shape: f32[1,32], index: 2, kind: input, shape index: {}]   ;;  %s255_s3 = inlined_call_operand.vmem [shape: f32[16,32], index: 3, kind: input, shape index: {}]   ;;  %s256_s4 = inlined_call_operand.vmem [shape: f32[1,32], index: 4, kind: input, shape index: {}]   ;;  %s257_s5 = inlined_call_operand.vmem [shape: f32[1,32], index: 5, kind: input, shape index: {}]   ;;  %s258_s6 = inlined_call_operand.vmem [shape: f32[16,32], index: 6, kind: output, shape index: {}]  }
   0x1   :  { %159 = vmatprep.subr.bf16.mxu0 %v175_v0  ;;  %v169_v1 = vld [vmem:[%s252_s1] sm:$0xff]   ;;  %163 = vmatprep.mubr.msk.bf16.mxu0 %vm176_vm0, %v175_v0  ;;  %v170_v2 = vld [vmem:[%s252_s1 + $0x8] sm:$0xff]  }
   0x2   :  { %160 = vmatpush3.bf16.msra.mxu0 %v169_v1  ;;  %v24_v3 = vld [vmem:[%s253_s0] sm:$0xff]  ;;  %v25_v4 = vld [vmem:[%s253_s0 + $0x8] sm:$0xff] }
   0x3   :  { %161 = vmatprep.subr.bf16.mxu0 %v175_v0  ;;  %v26_v5 = vpack.c.bf16 %v25_v4, %v24_v3  ;;  %v150_v6 = vld [vmem:[%s254_s2] ss:$0 sm:$0xff]  ;;  %v96_v12 = vld [vmem:[%s255_s3 + $0x8] sm:$0xff] }
   0x4   :  { %v95_v8 = vld [vmem:[%s255_s3] sm:$0xff] }
   0x5   :  { %v154_v36 = vld [vmem:[%s256_s4] ss:$0 sm:$0xff] }
   0x6   :  { %162 = vmatpush3.bf16.msra.mxu0 %v170_v2  ;;  %v155_v38 = vld [vmem:[%s257_s5] ss:$0 sm:$0xff] }
   0x9   :  { %164 = vmatmul.mubr.msk.bf16.vlgmr.msra.gmra.mrb[0].mxu0 %vm50_vm1, %v26_v5 }
  0xdc   :  { %v88_v7 = vpop.f32.mrb[0].mxu0 }
  0xdd   :  { %v89_v9 = vadd.f32 %v150_v6, %v88_v7  ;;  %v165_v10 = vpop.f32.mrb[1].mxu0 }
  0xde   :  { %v91_v11 = vpop.f32.mrb[2].mxu0 }
  0xdf   :  { %v92_v13 = vadd.f32 %v150_v6, %v91_v11  ;;  %v166_v14 = vpop.f32.mrb[3].mxu0  ;;  %v97_v15 = vadd.f32 %v95_v8, %v89_v9 }
  0xe1   :  { %v99_v16 = vsel %vm50_vm1, %v97_v15, 0.0  ;;  %v98_v17 = vadd.f32 %v96_v12, %v92_v13 }
  0xe2   :  { %100 = vadd.xlane.f32.xlu0 %v99_v16 }
  0xe3   :  { %v102_v18 = vsel %vm50_vm1, %v98_v17, 0.0 }
  0xe6   :  { %103 = vadd.xlane.f32.xlu0 %v102_v18 }
 0x16f   :  { %v101_v19 = vpop.xlane.xlu0 %100 }
 0x170   :  { %v106_v20 = vmul.f32 0.03125, %v101_v19 }
 0x172   :  { %v108_v21 = vsub.f32 %v97_v15, %v106_v20 }
 0x173   :  { %v104_v22 = vpop.xlane.xlu0 %103 }
 0x174   :  { %v107_v23 = vmul.f32 0.03125, %v104_v22  ;;  %v110_v24 = vmul.f32 %v108_v21, %v108_v21 }
 0x176   :  { %v109_v25 = vsub.f32 %v98_v17, %v107_v23  ;;  %v112_v26 = vsel %vm50_vm1, %v110_v24, 0.0 }
 0x177   :  { %113 = vadd.xlane.f32.xlu1 %v112_v26 }
 0x178   :  { %v111_v27 = vmul.f32 %v109_v25, %v109_v25 }
 0x17a   :  { %v115_v28 = vsel %vm50_vm1, %v111_v27, 0.0 }
 0x17b   :  { %116 = vadd.xlane.f32.xlu1 %v115_v28 }
 0x204   :  { %v114_v29 = vpop.xlane.xlu1 %113 }
 0x205   :  { %v118_v30 = vmul.f32 0.03125, %v114_v29 }
 0x207   :  { %v120_v31 = vadd.f32 1e-05, %v118_v30 }
 0x208   :  { %v117_v32 = vpop.xlane.xlu1 %116 }
 0x209   :  { %171 = vrsqrt.f32 %v120_v31  ;;  %v119_v33 = vmul.f32 0.03125, %v117_v32 }
 0x20b   :  { %v121_v34 = vadd.f32 1e-05, %v119_v33 }
 0x20d   :  { %173 = vrsqrt.f32 %v121_v34 }
 0x213   :  { %v172_v35 = vpop.eup %171 }
 0x214   :  { %v124_v37 = vmul.f32 %v172_v35, %v108_v21 }
 0x216   :  { %v133_v39 = vmul.f32 %v154_v36, %v124_v37 }
 0x217   :  { %v174_v40 = vpop.eup %173 }
 0x218   :  { %v142_v41 = vadd.f32 %v155_v38, %v133_v39  ;;  %v125_v42 = vmul.f32 %v174_v40, %v109_v25 }
 0x21a   :  { %144 = vst.msk [vmem:[%s258_s6] sm:$0xff] %vm50_vm1, %v142_v41  ;;  %v134_v43 = vmul.f32 %v154_v36, %v125_v42 }
 0x21c   :  { %v143_v44 = vadd.f32 %v155_v38, %v134_v43 }
 0x21e   :  { %145 = vst.msk [vmem:[%s258_s6 + $0x8] sm:$0xff] %vm50_vm1, %v143_v44 }

// kernel: transformer_model.12
= control target key start
LH: loop header
LB: loop body
LE: loop exit
PB: predicated region body
PF: predicated region fallthrough
CT: control target
= control target key end

     0   :  { %v442_v1 = vmov 0   ;;  %vm31_vm0 = vcmask 261120   ;;  %v43_v24 = vlaneseq  ;;  %v443_v45 = vmov 0.0   ;;  %s587_s1 = inlined_call_operand.vmem [shape: bf16[32,256], index: 1, kind: input, shape index: {}]   ;;  %s588_s0 = inlined_call_operand.vmem [shape: f32[16,32], index: 0, kind: input, shape index: {}]   ;;  %s589_s3 = inlined_call_operand.vmem [shape: bf16[256,32], index: 3, kind: input, shape index: {}]   ;;  %s590_s2 = inlined_call_operand.vmem [shape: f32[1,256], index: 2, kind: input, shape index: {}]   ;;  %s591_s4 = inlined_call_operand.vmem [shape: f32[1,32], index: 4, kind: input, shape index: {}]   ;;  %s592_s5 = inlined_call_operand.vmem [shape: f32[1,32], index: 5, kind: input, shape index: {}]   ;;  %s593_s6 = inlined_call_operand.vmem [shape: f32[1,32], index: 6, kind: input, shape index: {}]   ;;  %s594_s7 = inlined_call_operand.vmem [shape: f32[16,32], index: 7, kind: output, shape index: {}]  }
   0x1   :  { %v416_v0 = vld [vmem:[%s587_s1 + $0x4] ss:$8 sps:$4 sm:$0xff]   ;;  %109 = vmatprep.mubr.bf16.mxu0 %v442_v1  ;;  %v418_v2 = vld [vmem:[%s587_s1] ss:$8 sps:$4 sm:$0xff]   ;;  %v419_v3 = vld [vmem:[%s587_s1 + $0x14] ss:$8 sps:$4 sm:$0xff]  }
   0x2   :  { %77 = vmatprep.subr.bf16.mxu0 %v416_v0  ;;  %v421_v4 = vld [vmem:[%s587_s1 + $0x10] ss:$8 sps:$4 sm:$0xff]   ;;  %v499_v5 = vld [vmem:[%s588_s0] sm:$0xff]  ;;  %v504_v6 = vld [vmem:[%s588_s0 + $0x8] sm:$0xff]  ;;  %v44_v25 = vshrl.u32 %v43_v24, 7  ;;  %32 = vst.msk [vmem:[#allocation2] sm:$0xff] %vm31_vm0, %v443_v45 }
   0x3   :  { %78 = vmatpush1.bf16.msra.mxu0 %v418_v2  ;;  %v422_v7 = vld [vmem:[%s589_s3 + $0x40] sm:$0xff]   ;;  %v36_v9 = vpack.c.bf16 %v504_v6, %v499_v5  ;;  %v424_v10 = vld [vmem:[%s589_s3 + $0x48] sm:$0xff]   ;;  %v426_v12 = vld [vmem:[%s589_s3 + $0x50] sm:$0xff]   ;;  %33 = vst.msk [vmem:[#allocation2 + $0x8] sm:$0xff] %vm31_vm0, %v443_v45 }
   0x4   :  { %79 = vmatprep.subr.bf16.mxu0 %v419_v3  ;;  %v423_v8 = vld [vmem:[%s589_s3] sm:$0xff]   ;;  %392 = vmatprep.subr.bf16.mxu1 %v422_v7  ;;  %v425_v11 = vld [vmem:[%s589_s3 + $0x8] sm:$0xff]   ;;  %v427_v13 = vld [vmem:[%s589_s3 + $0x10] sm:$0xff]   ;;  %v45_v26 = vsub.s32 0, %v44_v25  ;;  %v49_v28 = vsub.s32 1, %v44_v25 }
   0x5   :  { %393 = vmatpush3.bf16.msra.mxu1 %v423_v8  ;;  %v428_v14 = vld [vmem:[%s589_s3 + $0x58] sm:$0xff]   ;;  %v430_v16 = vld [vmem:[%s589_s3 + $0x60] sm:$0xff]   ;;  %v432_v18 = vld [vmem:[%s589_s3 + $0x68] sm:$0xff]  }
   0x6   :  { %394 = vmatprep.subr.bf16.mxu1 %v424_v10  ;;  %v429_v15 = vld [vmem:[%s589_s3 + $0x18] sm:$0xff]   ;;  %v431_v17 = vld [vmem:[%s589_s3 + $0x20] sm:$0xff]   ;;  %v433_v19 = vld [vmem:[%s589_s3 + $0x28] sm:$0xff]  }
   0x7   :  { %80 = vmatpush1.bf16.msra.mxu0 %v421_v4  ;;  %v434_v20 = vld [vmem:[%s589_s3 + $0x70] sm:$0xff]   ;;  %v436_v22 = vld [vmem:[%s589_s3 + $0x78] sm:$0xff]   ;;  %v41_v27 = vld [vmem:[%s590_s2] sm:$0x3] }
   0x8   :  { %v435_v21 = vld [vmem:[%s589_s3 + $0x30] sm:$0xff]   ;;  %v437_v23 = vld [vmem:[%s589_s3 + $0x38] sm:$0xff]   ;;  %v46_v29 = vrot.slane %v41_v27, %v45_v26  ;;  %v50_v30 = vrot.slane %v41_v27, %v49_v28  ;;  %v389_v57 = vld [vmem:[%s591_s4] ss:$0 sm:$0xff] }
   0x9   :  { %395 = vmatpush3.bf16.msra.mxu1 %v425_v11  ;;  %v124_v47 = vld [vmem:[#allocation2] sm:$0xff] }
   0xa   :  { %372 = vmatmul.mubr.msk.bf16.vlgmr.msra.gmra.mrb[0].mxu0 %vm31_vm0, %v36_v9  ;;  %396 = vmatprep.subr.bf16.mxu1 %v426_v12  ;;  %v125_v51 = vld [vmem:[#allocation2 + $0x8] sm:$0xff] }
   0xd   :  { %397 = vmatpush3.bf16.msra.mxu1 %v427_v13 }
   0xe   :  { %398 = vmatprep.subr.bf16.mxu1 %v428_v14 }
  0x11   :  { %399 = vmatpush3.bf16.msra.mxu1 %v429_v15 }
  0x12   :  { %400 = vmatprep.subr.bf16.mxu1 %v430_v16 }
  0x15   :  { %401 = vmatpush3.bf16.msra.mxu1 %v431_v17 }
  0x16   :  { %402 = vmatprep.subr.bf16.mxu1 %v432_v18  ;;  %v390_v18 = vld [vmem:[%s592_s5] ss:$0 sm:$0xff] }
  0x19   :  { %403 = vmatpush3.bf16.msra.mxu1 %v433_v19 }
  0x1a   :  { %404 = vmatprep.subr.bf16.mxu1 %v434_v20  ;;  %v391_v20 = vld [vmem:[%s593_s6] ss:$0 sm:$0xff] }
  0x1d   :  { %405 = vmatpush3.bf16.msra.mxu1 %v435_v21 }
  0x1e   :  { %406 = vmatprep.subr.bf16.mxu1 %v436_v22 }
  0x21   :  { %407 = vmatpush3.bf16.msra.mxu1 %v437_v23 }
  0xdd   :  { %v111_v31 = vpop.f32.mrb[0].mxu0 }
  0xde   :  { %v112_v32 = vadd.f32 %v111_v31, %v46_v29  ;;  %v113_v33 = vpop.f32.mrb[1].mxu0 }
  0xdf   :  { %v114_v34 = vadd.f32 %v113_v33, %v50_v30  ;;  %v115_v35 = vpop.f32.mrb[2].mxu0 }
  0xe0   :  { %v116_v36 = vadd.f32 %v115_v35, %v46_v29  ;;  %v117_v37 = vpop.f32.mrb[3].mxu0  ;;  %v120_v39 = vmax.f32 %v112_v32, 0.0 }
  0xe1   :  { %v118_v38 = vadd.f32 %v117_v37, %v50_v30  ;;  %v121_v41 = vmax.f32 %v114_v34, 0.0 }
  0xe2   :  { %v122_v40 = vmax.f32 %v116_v36, 0.0 }
  0xe3   :  { %v123_v42 = vmax.f32 %v118_v38, 0.0 }
  0xe4   :  { %v126_v43 = vpack.c.bf16 %v122_v40, %v120_v39 }
  0xe5   :  { %v127_v44 = vpack.c.bf16 %v123_v42, %v121_v41 }
  0xe7   :  { %288 = vmatprep.mubr.bf16.mxu1 %v127_v44 }
  0xe8   :  { %289 = vmatmul.mubr.bf16.vlgmr.msra.gmra.mrb[0].mxu1 %v126_v43 }
 0x1bb   :  { %v408_v46 = vpop.f32.mrb[0].mxu1 }
 0x1bc   :  { %v409_v48 = vpop.f32.mrb[1].mxu1 }
 0x1bd   :  { %v410_v49 = vadd.f32 %v409_v48, %v408_v46  ;;  %v411_v50 = vpop.f32.mrb[2].mxu1 }
 0x1be   :  { %v412_v52 = vpop.f32.mrb[3].mxu1 }
 0x1bf   :  { %v297_v53 = vadd.f32 %v410_v49, %v124_v47  ;;  %v413_v54 = vadd.f32 %v412_v52, %v411_v50 }
 0x1c1   :  { %299 = vst.msk [vmem:[#allocation2] sm:$0xff] %vm31_vm0, %v297_v53  ;;  %v298_v55 = vadd.f32 %v413_v54, %v125_v51 }
 0x1c3   :  { %300 = vst.msk [vmem:[#allocation2 + $0x8] sm:$0xff] %vm31_vm0, %v298_v55 }
 0x1c8   :  { %v304_v56 = vld [vmem:[#allocation2] sm:$0xff] }
 0x1c9   :  { %v306_v58 = vadd.f32 %v304_v56, %v499_v5 }
 0x1ca   :  { %v305_v59 = vld [vmem:[#allocation2 + $0x8] sm:$0xff] }
 0x1cb   :  { %v315_v60 = vadd.f32 %v389_v57, %v306_v58  ;;  %v307_v61 = vadd.f32 %v305_v59, %v504_v6 }
 0x1cd   :  { %v317_v62 = vsel %vm31_vm0, %v315_v60, 0.0  ;;  %v316_v63 = vadd.f32 %v389_v57, %v307_v61 }
 0x1ce   :  { %318 = vadd.xlane.f32.xlu0 %v317_v62 }
 0x1cf   :  { %v320_v0 = vsel %vm31_vm0, %v316_v63, 0.0 }
 0x1d2   :  { %321 = vadd.xlane.f32.xlu0 %v320_v0 }
 0x25b   :  { %v319_v1 = vpop.xlane.xlu0 %318 }
 0x25c   :  { %v324_v2 = vmul.f32 0.03125, %v319_v1 }
 0x25e   :  { %v326_v3 = vsub.f32 %v315_v60, %v324_v2 }
 0x25f   :  { %v322_v4 = vpop.xlane.xlu0 %321 }
 0x260   :  { %v325_v7 = vmul.f32 0.03125, %v322_v4  ;;  %v328_v8 = vmul.f32 %v326_v3, %v326_v3 }
 0x262   :  { %v327_v9 = vsub.f32 %v316_v63, %v325_v7  ;;  %v330_v5 = vsel %vm31_vm0, %v328_v8, 0.0 }
 0x263   :  { %331 = vadd.xlane.f32.xlu1 %v330_v5 }
 0x264   :  { %v329_v10 = vmul.f32 %v327_v9, %v327_v9 }
 0x266   :  { %v333_v6 = vsel %vm31_vm0, %v329_v10, 0.0 }
 0x267   :  { %334 = vadd.xlane.f32.xlu1 %v333_v6 }
 0x2f0   :  { %v332_v11 = vpop.xlane.xlu1 %331 }
 0x2f1   :  { %v336_v12 = vmul.f32 0.03125, %v332_v11 }
 0x2f3   :  { %v338_v13 = vadd.f32 1e-05, %v336_v12 }
 0x2f4   :  { %v335_v14 = vpop.xlane.xlu1 %334 }
 0x2f5   :  { %438 = vrsqrt.f32 %v338_v13  ;;  %v337_v15 = vmul.f32 0.03125, %v335_v14 }
 0x2f7   :  { %v339_v16 = vadd.f32 1e-05, %v337_v15 }
 0x2f9   :  { %440 = vrsqrt.f32 %v339_v16 }
 0x2ff   :  { %v439_v17 = vpop.eup %438 }
 0x300   :  { %v342_v19 = vmul.f32 %v439_v17, %v326_v3 }
 0x302   :  { %v351_v21 = vmul.f32 %v390_v18, %v342_v19 }
 0x303   :  { %v441_v22 = vpop.eup %440 }
 0x304   :  { %v360_v23 = vadd.f32 %v391_v20, %v351_v21  ;;  %v343_v24 = vmul.f32 %v441_v22, %v327_v9 }
 0x306   :  { %362 = vst.msk [vmem:[%s594_s7] sm:$0xff] %vm31_vm0, %v360_v23  ;;  %v352_v25 = vmul.f32 %v390_v18, %v343_v24 }
 0x308   :  { %v361_v26 = vadd.f32 %v391_v20, %v352_v25 }
 0x30a   :  { %363 = vst.msk [vmem:[%s594_s7 + $0x8] sm:$0xff] %vm31_vm0, %v361_v26 }

// kernel: transformer_model.17
= control target key start
LH: loop header
LB: loop body
LE: loop exit
PB: predicated region body
PF: predicated region fallthrough
CT: control target
= control target key end

     0   :  { %s527_s12 = smov 0   ;;  %s529_s13 = smov 0   ;;  %s569_s0 = inlined_call_operand.vmem [shape: f32[2,8,32], index: 0, kind: input, shape index: {}]   ;;  %s570_s1 = inlined_call_operand.vmem [shape: bf16[32,128], index: 1, kind: input, shape index: {}]   ;;  %s571_s2 = inlined_call_operand.vmem [shape: f32[1,128], index: 2, kind: input, shape index: {}]   ;;  %s572_s3 = inlined_call_operand.vmem [shape: f32[8,256], index: 3, kind: output, shape index: {}]  }
   0x1   :  { %s531_s14 = smov 0  }
   0x2 LB: > { %s28_s15 = sadd.s32 1, %s499_s13  ;;  %p433_p0 = scmp.ge.s32.totalorder %s503_s14, 1  ;;  %s503_s14 = sphi %s531_s14, %s13_s14   ;;  %s499_s13 = sphi %s529_s13, %s574_s13   ;;  %s495_s12 = sphi %s527_s12, %s573_s12  }
   0x3   : > { %p30_p1 = scmp.ge.s32.totalorder %s28_s15, 2  ;;  %p181_p2 = scmp.lt.s32.totalorder %s503_s14, 3 }
   0x5   : > { %s576_s15 = smov (%p30_p1, %s28_s15), 0  ;;  %p182_p3 = pnand %p433_p0, %p181_p2 }
   0x6   : > { %v479_v0 = vld [vmem:[%s570_s1] sm:$0xff] (!%p182_p3)   ;;  %v505_v1 = vmov (!%p182_p3), 0.0   ;;  %v480_v2 = vld [vmem:[%s570_s1 + $0x8] sm:$0xff] (!%p182_p3)   ;;  %vm506_vm0 = vmmov (!%p182_p3), 0   ;;  %p218_p4 = scmp.lt.s32.totalorder (!%p182_p3), %s495_s12, 1  ;;  %vm268_vm1 = vcmask (!%p182_p3), 261120  }
   0x7   : > { %185 = sbr.rel (%p182_p3) target bundleno = 235 (0xeb), region = 32  ;;  %445 = vmatprep.subr.bf16.mxu0 (!%p182_p3), %v505_v1  ;;  %449 = vmatprep.mubr.msk.bf16.mxu0 (!%p182_p3), %vm506_vm0, %v505_v1  ;;  %v436_v5 = vld [vmem:[%s571_s2] ss:$0 sm:$0xff] (!%p182_p3) }
   0x8   : > { %446 = vmatpush3.bf16.msra.mxu0 (!%p182_p3), %v479_v0 }
   0x9   : > { %447 = vmatprep.subr.bf16.mxu0 (!%p182_p3), %v505_v1 }
   0xc   : > { %448 = vmatpush3.bf16.msra.mxu0 (!%p182_p3), %v480_v2 }
   0xe   : > { %s578_s12 = smov (!%p218_p4, %s495_s12), 1 }
   0xf   : > { %s434_s20 = sshll.u32 %s578_s12, 3 }
  0x10   : > { %s224_s23 = scalar_lea.vmem %s569_s0, %s434_s20  ;;  %s240_s28 = scalar_lea.vmem %s572_s3, %s434_s20 }
  0x11   : > { %v243_v3 = vld [vmem:[%s224_s23] sm:$0xff] }
  0x12   : > { %v244_v4 = vpack.c.bf16 %v243_v3, %v243_v3 }
  0x14   : > { %450 = vmatmul.mubr.msk.bf16.vlgmr.msra.gmra.mrb[0].mxu0 %vm268_vm1, %v244_v4 }
  0xe7   : > { %v306_v6 = vpop.f32.mrb[0].mxu0 }
  0xe8   : > { %v307_v7 = vadd.f32 %v436_v5, %v306_v6  ;;  %v451_v8 = vpop.f32.mrb[1].mxu0 }
  0xe9   : > { %v309_v9 = vpop.f32.mrb[2].mxu0 }
  0xea   : > { %312 = vst [vmem:[%s240_s28] sm:$0xff] %v307_v7  ;;  %v452_v10 = vpop.f32.mrb[3].mxu0 }
  0xeb PF: > { %s13_s14 = sadd.s32 1, %s503_s14   ;;  %s573_s12 = smov %s499_s13 }
  0xec   : > { %p10_p5 = scmp.ge.s32.totalorder %s13_s14, 4   ;;  %s574_s13 = smov %s576_s15 }
  0xee   :  { %12 = sbr.rel (!%p10_p5) target bundleno = 2 (0x2), region = 68 }

</bundles_post_ra>
